<compile_context>
chip_gen: v7x
topology: tpu7x:2x2x1
jax: 0.10.0
libtpu: 0.0.40
codegen_flags: <defaults>
</compile_context>

<pallas_src>
import jax
import jax.numpy as jnp
from jax.experimental import pallas as pl
from jax.experimental.pallas import tpu as pltpu


BN_EPS = 1e-5
PADDED_OUT = 128          # lane-dense output width
NEG_FILL = -1e30          # bias for padded output columns -> exp(.) == 0


# ---------------------------------------------------------------------------
# Kernel
# ---------------------------------------------------------------------------
def count_feature_kernel(
    x_ref,
    w1_ref, b1_ref,
    w2_ref, b2_ref,
    w3_ref, b3_ref,
    w4_ref, b4_ref,
    out_ref,
):
    """Fused MLP forward on one batch tile. BN already folded into W/b."""

    def layer(h, w_ref, b_ref):
        z = jnp.dot(h.astype(jnp.bfloat16), w_ref[...],
                    preferred_element_type=jnp.float32) + b_ref[...]
        return jnp.maximum(z, 0.0)

    h = layer(x_ref[...], w1_ref, b1_ref)      # fc1 (+bn1 folded) + relu
    h = layer(h, w2_ref, b2_ref)               # fc2 (+bn2 folded) + relu
    h = layer(h, w3_ref, b3_ref)               # fc3 (+bn3 folded) + relu

    # fc4 (padded to 128 lane-dense columns) + softmax over the feature axis.
    logits = jnp.dot(h.astype(jnp.bfloat16), w4_ref[...],
                     preferred_element_type=jnp.float32) + b4_ref[...]
    m = jnp.max(logits, axis=1, keepdims=True)
    e = jnp.exp(logits - m)
    denom = jnp.sum(e, axis=1, keepdims=True)
    out_ref[...] = e * pl.reciprocal(denom, approx=True)


# ---------------------------------------------------------------------------
# Wrapper
# ---------------------------------------------------------------------------
def count_feature_nn_forward(x, folded_params, out_size, *, tm=256):
    """Runs the fused forward pass. `folded_params` comes from fold_params()."""
    w1, b1, w2, b2, w3, b3, w4, b4 = folded_params
    batch, num_feature = x.shape

    # Batch tile: 256 fills the 256x256 MXU on v6e/v7x (128 suffices on v5e);
    # small batches use a single full-batch tile. VMEM stays far below the
    # 32 MiB scoped default (bf16 weights ~1.6 MiB + TM x 2048 f32 slab).
    tm = batch if batch <= tm else tm
    grid = (pl.cdiv(batch, tm),)

    def resident(shape):
        # Same block every grid step -> DMA'd once, stays resident in VMEM.
        return pl.BlockSpec(shape, lambda i: (0, 0))

    out_padded = pl.pallas_call(
        count_feature_kernel,
        out_shape=jax.ShapeDtypeStruct((batch, PADDED_OUT), jnp.float32),
        grid_spec=pltpu.PrefetchScalarGridSpec(
            num_scalar_prefetch=0,
            grid=grid,
            in_specs=[
                pl.BlockSpec((tm, num_feature), lambda i: (i, 0)),
                resident(w1.shape), resident(b1.shape),
                resident(w2.shape), resident(b2.shape),
                resident(w3.shape), resident(b3.shape),
                resident(w4.shape), resident(b4.shape),
            ],
            out_specs=pl.BlockSpec((tm, PADDED_OUT), lambda i: (i, 0)),
        ),
        compiler_params=pltpu.CompilerParams(
            dimension_semantics=("parallel",),   # lets v7x use both TCs
        ),
    )(x, w1, b1, w2, b2, w3, b3, w4, b4)

    return out_padded[:, :out_size]


# ---------------------------------------------------------------------------
# Parameters: raw (PyTorch-equivalent) init + offline folding/packing
# ---------------------------------------------------------------------------
def init_raw_params(key, num_feature, out_size):
    """PyTorch-equivalent parameters; Linear weights stored as [in, out]."""
    dims = [(num_feature, 128), (128, 2048), (2048, 256), (256, out_size)]
    keys = jax.random.split(key, 16)
    k = iter(keys)

    def linear(fan_in, fan_out):
        # nn.Linear default init: U(-1/sqrt(fan_in), 1/sqrt(fan_in))
        bound = 1.0 / float(fan_in) ** 0.5
        w = jax.random.uniform(next(k), (fan_in, fan_out), jnp.float32, -bound, bound)
        b = jax.random.uniform(next(k), (fan_out,), jnp.float32, -bound, bound)
        return w, b

    def bn(c):
        gamma = jnp.ones((c,), jnp.float32)
        beta = jnp.zeros((c,), jnp.float32)
        # Synthetic (deterministic) running stats so the BN path is exercised.
        mean = 0.1 * jax.random.normal(next(k), (c,), jnp.float32)
        var = 1.0 + 0.1 * jax.random.uniform(next(k), (c,), jnp.float32)
        return gamma, beta, mean, var

    p = {}
    p["fc1"] = linear(*dims[0]); p["bn1"] = bn(128)
    p["fc2"] = linear(*dims[1]); p["bn2"] = bn(2048)
    p["fc3"] = linear(*dims[2]); p["bn3"] = bn(256)
    p["fc4"] = linear(*dims[3])
    return p


def fold_params(raw, out_size):
    """Fold eval-mode BN into the Linear weights, cast weights to bf16, and
    pad the output layer to a lane-dense 128 columns."""

    def fold_linear_bn(fc, bn):
        w, b = fc
        gamma, beta, mean, var = bn
        scale = gamma / jnp.sqrt(var + BN_EPS)            # (C,)
        shift = beta - mean * scale                        # (C,)
        w_f = (w * scale[None, :]).astype(jnp.bfloat16)    # [in, out] bf16
        b_f = (b * scale + shift)[None, :]                 # (1, C) f32
        return w_f, b_f

    w1, b1 = fold_linear_bn(raw["fc1"], raw["bn1"])
    w2, b2 = fold_linear_bn(raw["fc2"], raw["bn2"])
    w3, b3 = fold_linear_bn(raw["fc3"], raw["bn3"])

    w4, b4 = raw["fc4"]
    in_f = w4.shape[0]
    w4_p = jnp.zeros((in_f, PADDED_OUT), jnp.float32).at[:, :out_size].set(w4)
    b4_p = jnp.full((PADDED_OUT,), NEG_FILL, jnp.float32).at[:out_size].set(b4)
    return (w1, b1, w2, b2, w3, b3,
            w4_p.astype(jnp.bfloat16), b4_p[None, :])


# ---------------------------------------------------------------------------
# Pure-JAX references
# ---------------------------------------------------------------------------
def reference_forward_folded(x, folded_params, out_size):
    """Reference at the kernel's precision (bf16 weights, f32 accumulation)."""
    w1, b1, w2, b2, w3, b3, w4, b4 = folded_params
    h = x
    for w, b in ((w1, b1), (w2, b2), (w3, b3)):
        h = jnp.maximum(
            jnp.dot(h.astype(jnp.bfloat16), w, preferred_element_type=jnp.float32) + b,
            0.0)
    logits = jnp.dot(h.astype(jnp.bfloat16), w4,
                     preferred_element_type=jnp.float32) + b4
    return jax.nn.softmax(logits, axis=1)[:, :out_size]


def reference_forward_f32(x, raw):
    """Full-precision reference with PyTorch semantics (eval-mode BN)."""
    def bn(h, p):
        gamma, beta, mean, var = p
        return (h - mean) / jnp.sqrt(var + BN_EPS) * gamma + beta

    h = x
    for fc, bnp in (("fc1", "bn1"), ("fc2", "bn2"), ("fc3", "bn3")):
        w, b = raw[fc]
        h = jnp.maximum(bn(h @ w + b, raw[bnp]), 0.0)
    w4, b4 = raw["fc4"]
    return jax.nn.softmax(h @ w4 + b4, axis=1)


# ---------------------------------------------------------------------------
if __name__ == "__main__":
    num_feature = 16
    out_size = 8
    batch = 8

    key = jax.random.PRNGKey(0)
    kx, kp = jax.random.split(key)
    x = jax.random.normal(kx, (batch, num_feature), jnp.float32)

    raw = init_raw_params(kp, num_feature, out_size)
    folded = fold_params(raw, out_size)

    out = count_feature_nn_forward(x, folded, out_size)
    out = jax.block_until_ready(out)
    assert out.shape == (batch, out_size)

    # Kernel vs same-precision JAX reference (bf16 weights, f32 accumulation).
    ref_bf16 = reference_forward_folded(x, folded, out_size)
    assert jnp.allclose(out, ref_bf16, atol=5e-3, rtol=5e-3), "mismatch vs bf16 reference"

    # Sanity vs full-precision PyTorch-semantics reference (loose tolerance:
    # covers the bf16 weight cast + approximate reciprocal).
    ref_f32 = reference_forward_f32(x, raw)
    assert jnp.allclose(out, ref_f32, atol=5e-2, rtol=5e-2), "mismatch vs f32 reference"

    # Softmax rows sum to ~1 (approx reciprocal adds ~1e-3-level error).
    assert jnp.allclose(jnp.sum(out, axis=1), 1.0, atol=5e-3), "rows must sum to ~1"

    print("KERNEL_OK")
</pallas_src>

<mosaic_0001>
module attributes {stable_mosaic.version = 11 : i64} {
  func.func @count_feature_kernel(%arg0: i32, %arg1: memref<8x16xf32, #tpu.memory_space<vmem>>, %arg2: memref<16x128xbf16, #tpu.memory_space<vmem>>, %arg3: memref<1x128xf32, #tpu.memory_space<vmem>>, %arg4: memref<128x2048xbf16, #tpu.memory_space<vmem>>, %arg5: memref<1x2048xf32, #tpu.memory_space<vmem>>, %arg6: memref<2048x256xbf16, #tpu.memory_space<vmem>>, %arg7: memref<1x256xf32, #tpu.memory_space<vmem>>, %arg8: memref<256x128xbf16, #tpu.memory_space<vmem>>, %arg9: memref<1x128xf32, #tpu.memory_space<vmem>>, %arg10: memref<8x128xf32, #tpu.memory_space<vmem>>) attributes {dimension_semantics = [#tpu.dimension_semantics<parallel>], iteration_bounds = array<i64: 1>, scalar_prefetch = 0 : i64, scratch_operands = 0 : i64, tpu.core_type = #tpu.core_type<tc>, window_params = [{transform_indices = @transform_0, window_bounds = array<i64: 8, 16>}, {pipeline_mode = #tpu.pipeline_mode<synchronous>, transform_indices = @transform_1, window_bounds = array<i64: 16, 128>}, {pipeline_mode = #tpu.pipeline_mode<synchronous>, transform_indices = @transform_2, window_bounds = array<i64: 1, 128>}, {pipeline_mode = #tpu.pipeline_mode<synchronous>, transform_indices = @transform_3, window_bounds = array<i64: 128, 2048>}, {pipeline_mode = #tpu.pipeline_mode<synchronous>, transform_indices = @transform_4, window_bounds = array<i64: 1, 2048>}, {pipeline_mode = #tpu.pipeline_mode<synchronous>, transform_indices = @transform_5, window_bounds = array<i64: 2048, 256>}, {pipeline_mode = #tpu.pipeline_mode<synchronous>, transform_indices = @transform_6, window_bounds = array<i64: 1, 256>}, {pipeline_mode = #tpu.pipeline_mode<synchronous>, transform_indices = @transform_7, window_bounds = array<i64: 256, 128>}, {pipeline_mode = #tpu.pipeline_mode<synchronous>, transform_indices = @transform_8, window_bounds = array<i64: 1, 128>}, {transform_indices = @transform_9, window_bounds = array<i64: 8, 128>}]} {
    %c0 = arith.constant 0 : index
    %c0_0 = arith.constant 0 : index
    %0 = vector.load %arg1[%c0, %c0_0] : memref<8x16xf32, #tpu.memory_space<vmem>>, vector<8x16xf32>
    %1 = arith.truncf %0 : vector<8x16xf32> to vector<8x16xbf16>
    %c0_1 = arith.constant 0 : index
    %c0_2 = arith.constant 0 : index
    %2 = vector.load %arg2[%c0_1, %c0_2] : memref<16x128xbf16, #tpu.memory_space<vmem>>, vector<16x128xbf16>
    %cst = arith.constant dense<0.000000e+00> : vector<8x128xf32>
    %3 = tpu.matmul %1, %2, %cst {dimension_numbers = #tpu.dot_dimension_numbers<[1], [0], [0], [1], [0, 0, 1, 1], [], []>} : vector<8x16xbf16>, vector<16x128xbf16>, vector<8x128xf32> -> vector<8x128xf32>
    %c0_3 = arith.constant 0 : index
    %c0_4 = arith.constant 0 : index
    %4 = vector.load %arg3[%c0_3, %c0_4] : memref<1x128xf32, #tpu.memory_space<vmem>>, vector<1x128xf32>
    %5 = vector.broadcast %4 : vector<1x128xf32> to vector<8x128xf32>
    %6 = arith.addf %3, %5 : vector<8x128xf32>
    %cst_5 = arith.constant 0.000000e+00 : f32
    %7 = vector.broadcast %cst_5 : f32 to vector<8x128xf32>
    %8 = arith.maximumf %6, %7 : vector<8x128xf32>
    %9 = arith.truncf %8 : vector<8x128xf32> to vector<8x128xbf16>
    %c0_6 = arith.constant 0 : index
    %c0_7 = arith.constant 0 : index
    %10 = vector.load %arg4[%c0_6, %c0_7] : memref<128x2048xbf16, #tpu.memory_space<vmem>>, vector<128x2048xbf16>
    %cst_8 = arith.constant dense<0.000000e+00> : vector<8x2048xf32>
    %11 = tpu.matmul %9, %10, %cst_8 {dimension_numbers = #tpu.dot_dimension_numbers<[1], [0], [0], [1], [0, 0, 1, 1], [], []>} : vector<8x128xbf16>, vector<128x2048xbf16>, vector<8x2048xf32> -> vector<8x2048xf32>
    %c0_9 = arith.constant 0 : index
    %c0_10 = arith.constant 0 : index
    %12 = vector.load %arg5[%c0_9, %c0_10] : memref<1x2048xf32, #tpu.memory_space<vmem>>, vector<1x2048xf32>
    %13 = vector.broadcast %12 : vector<1x2048xf32> to vector<8x2048xf32>
    %14 = arith.addf %11, %13 : vector<8x2048xf32>
    %cst_11 = arith.constant 0.000000e+00 : f32
    %15 = vector.broadcast %cst_11 : f32 to vector<8x2048xf32>
    %16 = arith.maximumf %14, %15 : vector<8x2048xf32>
    %17 = arith.truncf %16 : vector<8x2048xf32> to vector<8x2048xbf16>
    %c0_12 = arith.constant 0 : index
    %c0_13 = arith.constant 0 : index
    %18 = vector.load %arg6[%c0_12, %c0_13] : memref<2048x256xbf16, #tpu.memory_space<vmem>>, vector<2048x256xbf16>
    %cst_14 = arith.constant dense<0.000000e+00> : vector<8x256xf32>
    %19 = tpu.matmul %17, %18, %cst_14 {dimension_numbers = #tpu.dot_dimension_numbers<[1], [0], [0], [1], [0, 0, 1, 1], [], []>} : vector<8x2048xbf16>, vector<2048x256xbf16>, vector<8x256xf32> -> vector<8x256xf32>
    %c0_15 = arith.constant 0 : index
    %c0_16 = arith.constant 0 : index
    %20 = vector.load %arg7[%c0_15, %c0_16] : memref<1x256xf32, #tpu.memory_space<vmem>>, vector<1x256xf32>
    %21 = vector.broadcast %20 : vector<1x256xf32> to vector<8x256xf32>
    %22 = arith.addf %19, %21 : vector<8x256xf32>
    %cst_17 = arith.constant 0.000000e+00 : f32
    %23 = vector.broadcast %cst_17 : f32 to vector<8x256xf32>
    %24 = arith.maximumf %22, %23 : vector<8x256xf32>
    %25 = arith.truncf %24 : vector<8x256xf32> to vector<8x256xbf16>
    %c0_18 = arith.constant 0 : index
    %c0_19 = arith.constant 0 : index
    %26 = vector.load %arg8[%c0_18, %c0_19] : memref<256x128xbf16, #tpu.memory_space<vmem>>, vector<256x128xbf16>
    %cst_20 = arith.constant dense<0.000000e+00> : vector<8x128xf32>
    %27 = tpu.matmul %25, %26, %cst_20 {dimension_numbers = #tpu.dot_dimension_numbers<[1], [0], [0], [1], [0, 0, 1, 1], [], []>} : vector<8x256xbf16>, vector<256x128xbf16>, vector<8x128xf32> -> vector<8x128xf32>
    %c0_21 = arith.constant 0 : index
    %c0_22 = arith.constant 0 : index
    %28 = vector.load %arg9[%c0_21, %c0_22] : memref<1x128xf32, #tpu.memory_space<vmem>>, vector<1x128xf32>
    %29 = vector.broadcast %28 : vector<1x128xf32> to vector<8x128xf32>
    %30 = arith.addf %27, %29 : vector<8x128xf32>
    %cst_23 = arith.constant dense<0xFF800000> : vector<8xf32>
    %31 = vector.multi_reduction <maximumf>, %30, %cst_23 [1] : vector<8x128xf32> to vector<8xf32>
    %32 = vector.shape_cast %31 : vector<8xf32> to vector<8x1xf32>
    %33 = vector.broadcast %32 : vector<8x1xf32> to vector<8x128xf32>
    %34 = arith.subf %30, %33 : vector<8x128xf32>
    %35 = math.exp %34 : vector<8x128xf32>
    %cst_24 = arith.constant dense<0.000000e+00> : vector<8xf32>
    %36 = vector.multi_reduction <add>, %35, %cst_24 [1] : vector<8x128xf32> to vector<8xf32>
    %37 = vector.shape_cast %36 : vector<8xf32> to vector<8x1xf32>
    %38 = tpu.reciprocal %37 {approx = true} : vector<8x1xf32> -> vector<8x1xf32>
    %39 = vector.broadcast %38 : vector<8x1xf32> to vector<8x128xf32>
    %40 = arith.mulf %35, %39 : vector<8x128xf32>
    %c0_25 = arith.constant 0 : index
    %c0_26 = arith.constant 0 : index
    %41 = vector.load %arg10[%c0_25, %c0_26] : memref<8x128xf32, #tpu.memory_space<vmem>>, vector<8x128xf32>
    tpu.vector_store %arg10[%c0_25, %c0_26], %40 {strides = array<i32>} : memref<8x128xf32, #tpu.memory_space<vmem>>, vector<8x128xf32>,
    return
  }
  func.func @transform_0(%arg0: i32) -> (i32, i32) {
    %c0_i32 = arith.constant 0 : i32
    %c0_i32_0 = arith.constant 0 : i32
    return %arg0, %c0_i32 : i32, i32
  }
  func.func @transform_1(%arg0: i32) -> (i32, i32) {
    %c0_i32 = arith.constant 0 : i32
    %c0_i32_0 = arith.constant 0 : i32
    %c0_i32_1 = arith.constant 0 : i32
    return %c0_i32, %c0_i32_0 : i32, i32
  }
  func.func @transform_2(%arg0: i32) -> (i32, i32) {
    %c0_i32 = arith.constant 0 : i32
    %c0_i32_0 = arith.constant 0 : i32
    %c0_i32_1 = arith.constant 0 : i32
    return %c0_i32, %c0_i32_0 : i32, i32
  }
  func.func @transform_3(%arg0: i32) -> (i32, i32) {
    %c0_i32 = arith.constant 0 : i32
    %c0_i32_0 = arith.constant 0 : i32
    %c0_i32_1 = arith.constant 0 : i32
    return %c0_i32, %c0_i32_0 : i32, i32
  }
  func.func @transform_4(%arg0: i32) -> (i32, i32) {
    %c0_i32 = arith.constant 0 : i32
    %c0_i32_0 = arith.constant 0 : i32
    %c0_i32_1 = arith.constant 0 : i32
    return %c0_i32, %c0_i32_0 : i32, i32
  }
  func.func @transform_5(%arg0: i32) -> (i32, i32) {
    %c0_i32 = arith.constant 0 : i32
    %c0_i32_0 = arith.constant 0 : i32
    %c0_i32_1 = arith.constant 0 : i32
    return %c0_i32, %c0_i32_0 : i32, i32
  }
  func.func @transform_6(%arg0: i32) -> (i32, i32) {
    %c0_i32 = arith.constant 0 : i32
    %c0_i32_0 = arith.constant 0 : i32
    %c0_i32_1 = arith.constant 0 : i32
    return %c0_i32, %c0_i32_0 : i32, i32
  }
  func.func @transform_7(%arg0: i32) -> (i32, i32) {
    %c0_i32 = arith.constant 0 : i32
    %c0_i32_0 = arith.constant 0 : i32
    %c0_i32_1 = arith.constant 0 : i32
    return %c0_i32, %c0_i32_0 : i32, i32
  }
  func.func @transform_8(%arg0: i32) -> (i32, i32) {
    %c0_i32 = arith.constant 0 : i32
    %c0_i32_0 = arith.constant 0 : i32
    %c0_i32_1 = arith.constant 0 : i32
    return %c0_i32, %c0_i32_0 : i32, i32
  }
  func.func @transform_9(%arg0: i32) -> (i32, i32) {
    %c0_i32 = arith.constant 0 : i32
    %c0_i32_0 = arith.constant 0 : i32
    return %arg0, %c0_i32 : i32, i32
  }
}

</mosaic_0001>

<bundles_post_ra>
// kernel: tpu_custom_call.1
= control target key start
LH: loop header
LB: loop body
LE: loop exit
PB: predicated region body
PF: predicated region fallthrough
CT: control target
= control target key end

     0   :  { %14 = vsyncpa [#allocation3], 0  ;;  %s4787_s0 = inlined_call_operand.hbm [shape: f32[8,16], index: 0, kind: input, shape index: {}]   ;;  %s4788_s1 = inlined_call_operand.hbm [shape: bf16[16,128], index: 1, kind: input, shape index: {}]   ;;  %s4789_s2 = inlined_call_operand.vmem [shape: f32[1,128], index: 2, kind: input, shape index: {}]   ;;  %s4790_s3 = inlined_call_operand.hbm [shape: bf16[128,2048], index: 3, kind: input, shape index: {}]   ;;  %s4791_s4 = inlined_call_operand.hbm [shape: f32[1,2048], index: 4, kind: input, shape index: {}]   ;;  %s4792_s5 = inlined_call_operand.hbm [shape: bf16[2048,256], index: 5, kind: input, shape index: {}]   ;;  %s4793_s6 = inlined_call_operand.vmem [shape: f32[1,256], index: 6, kind: input, shape index: {}]   ;;  %s4794_s7 = inlined_call_operand.hbm [shape: bf16[256,128], index: 7, kind: input, shape index: {}]   ;;  %s4795_s8 = inlined_call_operand.vmem [shape: f32[1,128], index: 8, kind: input, shape index: {}]   ;;  %s4796_s9 = inlined_call_operand.hbm [shape: f32[8,128], index: 9, kind: output, shape index: {}]  }
   0x1   :  { %15 = vsyncpa [#allocation6], 0 }
   0x2   :  { %16 = vsyncpa [#allocation9], 0 }
   0x3   :  { %17 = vsyncpa [#allocation12], 0 }
   0x4   :  { %18 = vsyncpa [#allocation4], 0  ;;  %s4516_s30 = smov [#allocation5]   ;;  %s4352_s13 = scalar_lea.hbm %s4788_s1, 128 }
   0x5   :  { %s34_s10 = sshll.u32 %s4516_s30, 4  ;;  %p4353_p0 = scmp.ne.s32.totalorder %s4788_s1, %s4352_s13  ;;  %s35_s10 = int_to_ptr.vmem [resolvable:$true] %s34_s10 }
   0x6   :  { %p4356_p1 = scmp.lt.u32.totalorder %s4352_s13, %s4788_s1 }
   0x8   :  { %p4358_p2 = pnand %p4356_p1, %p4353_p0 }
   0xa   :  { %4361 = shalt.err (!%p4358_p2)
}
   0xb   :  { %s4362_s18 = scalar_lea.vmem %s35_s10, 128  ;;  %p4367_p4 = scmp.lt.s32.totalorder %s35_s10, %s35_s10 }
   0xc   :  { %p4363_p3 = scmp.ne.s32.totalorder %s35_s10, %s4362_s18  ;;  %p4368_p5 = scmp.lt.s32.totalorder %s4362_s18, %s4362_s18 }
   0xe   :  { %p4369_p6 = por %p4368_p5, %p4367_p4 }
  0x10   :  { %p4370_p7 = pnand %p4369_p6, %p4363_p3 }
  0x12   :  { %4373 = shalt.err (!%p4370_p7)
}
  0x13   :  { %s4517_s19 = smov 64   ;;  %s4518_s20 = smov 4  }
  0x14   :  { %40 = dma.hbm_to_vmem [thread:$0]  %s4788_s1, 128, %s35_s10, [#allocation6], %s4517_s19, %s4517_s19, %s4518_s20  }
  0x15   :  { %s4519_s23 = smov [#allocation8]   ;;  %s4520_s25 = smov [#allocation2]  }
  0x16   :  { %s61_s24 = sshll.u32 %s4519_s23, 4  ;;  %s25_s26 = sshll.u32 %s4520_s25, 4  ;;  %s62_s24 = int_to_ptr.vmem [resolvable:$true] %s61_s24  ;;  %s26_s26 = int_to_ptr.vmem [resolvable:$true] %s25_s26 }
  0x17   :  { %s4374_s29 = scalar_lea.hbm %s4791_s4, 256 }
  0x18   :  { %p4375_p8 = scmp.ne.s32.totalorder %s4791_s4, %s4374_s29  ;;  %p4378_p9 = scmp.lt.u32.totalorder %s4374_s29, %s4791_s4 }
  0x1a   :  { %p4380_p10 = pnand %p4378_p9, %p4375_p8 }
  0x1c   :  { %4383 = shalt.err (!%p4380_p10)
}
  0x1d   :  { %s4384_s1 = scalar_lea.vmem %s62_s24, 256  ;;  %p4389_p12 = scmp.lt.s32.totalorder %s62_s24, %s62_s24 }
  0x1e   :  { %p4385_p11 = scmp.ne.s32.totalorder %s62_s24, %s4384_s1  ;;  %p4390_p13 = scmp.lt.s32.totalorder %s4384_s1, %s4384_s1 }
  0x20   :  { %p4391_p0 = por %p4390_p13, %p4389_p12 }
  0x22   :  { %p4392_p1 = pnand %p4391_p0, %p4385_p11 }
  0x24   :  { %4395 = shalt.err (!%p4392_p1)
}
  0x25   :  { %64 = dma.hbm_to_vmem [thread:$0]  %s4791_s4, 256, %s62_s24, [#allocation9]  }
  0x26   :  { %s4396_s17 = scalar_lea.hbm %s4787_s0, 128 }
  0x27   :  { %p4397_p2 = scmp.ne.s32.totalorder %s4787_s0, %s4396_s17  ;;  %p4400_p3 = scmp.lt.u32.totalorder %s4396_s17, %s4787_s0 }
  0x29   :  { %p4402_p4 = pnand %p4400_p3, %p4397_p2 }
  0x2b   :  { %4405 = shalt.err (!%p4402_p4)
}
  0x2c   :  { %s4406_s25 = scalar_lea.vmem %s26_s26, 128  ;;  %p4411_p6 = scmp.lt.s32.totalorder %s26_s26, %s26_s26 }
  0x2d   :  { %p4407_p5 = scmp.ne.s32.totalorder %s26_s26, %s4406_s25  ;;  %p4412_p7 = scmp.lt.s32.totalorder %s4406_s25, %s4406_s25 }
  0x2f   :  { %p4413_p8 = por %p4412_p7, %p4411_p6 }
  0x31   :  { %p4414_p9 = pnand %p4413_p8, %p4407_p5 }
  0x33   :  { %4417 = shalt.err (!%p4414_p9)
}
  0x34   :  { %28 = dma.hbm_to_vmem [thread:$0]  %s4787_s0, 128, %s26_s26, [#allocation3]  }
  0x35   :  { %s4521_s27 = smov [#allocation7]   ;;  %s4418_s11 = scalar_lea.hbm %s4790_s3, 16384 }
  0x36   :  { %s48_s28 = sshll.u32 %s4521_s27, 4  ;;  %p4419_p10 = scmp.ne.s32.totalorder %s4790_s3, %s4418_s11  ;;  %s49_s28 = int_to_ptr.vmem [resolvable:$true] %s48_s28 }
  0x37   :  { %p4422_p11 = scmp.lt.u32.totalorder %s4418_s11, %s4790_s3 }
  0x39   :  { %p4424_p12 = pnand %p4422_p11, %p4419_p10 }
  0x3b   :  { %4427 = shalt.err (!%p4424_p12)
}
  0x3c   :  { %s4428_s14 = scalar_lea.vmem %s49_s28, 16384  ;;  %p4433_p0 = scmp.lt.s32.totalorder %s49_s28, %s49_s28 }
  0x3d   :  { %p4429_p13 = scmp.ne.s32.totalorder %s49_s28, %s4428_s14  ;;  %p4434_p1 = scmp.lt.s32.totalorder %s4428_s14, %s4428_s14 }
  0x3f   :  { %p4435_p2 = por %p4434_p1, %p4433_p0 }
  0x41   :  { %p4436_p3 = pnand %p4435_p2, %p4429_p13 }
  0x43   :  { %4439 = shalt.err (!%p4436_p3)
}
  0x44   :  { %s4522_s0 = smov 1024   ;;  %s4523_s16 = smov [#allocation10]  }
  0x45   :  { %54 = dma.hbm_to_vmem [thread:$0]  %s4790_s3, 16384, %s49_s28, [#allocation6], %s4522_s0, %s4522_s0, %s4517_s19  }
  0x46   :  { %s70_s17 = sshll.u32 %s4523_s16, 4  ;;  %s4440_s22 = scalar_lea.hbm %s4792_s5, 32768  ;;  %s71_s17 = int_to_ptr.vmem [resolvable:$true] %s70_s17 }
  0x47   :  { %p4441_p4 = scmp.ne.s32.totalorder %s4792_s5, %s4440_s22  ;;  %p4444_p5 = scmp.lt.u32.totalorder %s4440_s22, %s4792_s5 }
  0x49   :  { %p4446_p6 = pnand %p4444_p5, %p4441_p4 }
  0x4b   :  { %4449 = shalt.err (!%p4446_p6)
}
  0x4c   :  { %s4450_s27 = scalar_lea.vmem %s71_s17, 32768  ;;  %p4455_p8 = scmp.lt.s32.totalorder %s71_s17, %s71_s17 }
  0x4d   :  { %p4451_p7 = scmp.ne.s32.totalorder %s71_s17, %s4450_s27  ;;  %p4456_p9 = scmp.lt.s32.totalorder %s4450_s27, %s4450_s27 }
  0x4f   :  { %p4457_p10 = por %p4456_p9, %p4455_p8 }
  0x51   :  { %p4458_p11 = pnand %p4457_p10, %p4451_p7 }
  0x53   :  { %4461 = shalt.err (!%p4458_p11)
}
  0x54   :  { %s4524_s3 = smov 128   ;;  %s4525_s28 = smov 8  }
  0x55   :  { %76 = dma.hbm_to_vmem [thread:$0]  %s4792_s5, 32768, %s71_s17, [#allocation9], %s4524_s3, %s4524_s3, %s4525_s28  }
  0x56   :  { %s4526_s11 = smov [#allocation11]   ;;  %s4462_s10 = scalar_lea.hbm %s4794_s7, 2048 }
  0x57   :  { %s84_s12 = sshll.u32 %s4526_s11, 4  ;;  %p4463_p12 = scmp.ne.s32.totalorder %s4794_s7, %s4462_s10  ;;  %s85_s12 = int_to_ptr.vmem [resolvable:$true] %s84_s12 }
  0x58   :  { %p4466_p13 = scmp.lt.u32.totalorder %s4462_s10, %s4794_s7 }
  0x5a   :  { %p4468_p0 = pnand %p4466_p13, %p4463_p12 }
  0x5c   :  { %4471 = shalt.err (!%p4468_p0)
}
  0x5d   :  { %s4472_s16 = scalar_lea.vmem %s85_s12, 2048  ;;  %p4477_p2 = scmp.lt.s32.totalorder %s85_s12, %s85_s12 }
  0x5e   :  { %p4473_p1 = scmp.ne.s32.totalorder %s85_s12, %s4472_s16  ;;  %p4478_p3 = scmp.lt.s32.totalorder %s4472_s16, %s4472_s16 }
  0x60   :  { %p4479_p4 = por %p4478_p3, %p4477_p2 }
  0x62   :  { %p4480_p5 = pnand %p4479_p4, %p4473_p1 }
  0x64   :  { %4483 = shalt.err (!%p4480_p5)
}
  0x65   :  { %90 = dma.hbm_to_vmem [thread:$0]  %s4794_s7, 2048, %s85_s12, [#allocation12], %s4517_s19, %s4517_s19, %s4518_s20  }
  0x66   :  { %4506 = dma.done.wait [#allocation3], 128  }
  0x67   :  { %4507 = vsyncadd [#allocation3], 4294967168 }
  0x68   :  { %4508 = dma.done.wait [#allocation6], 16512  }
  0x69   :  { %4509 = vsyncadd [#allocation6], 4294950784 }
  0x6a   :  { %4510 = dma.done.wait [#allocation9], 33024  }
  0x6b   :  { %4511 = vsyncadd [#allocation9], 4294934272 }
  0x6c   :  { %4512 = dma.done.wait [#allocation12], 2048  }
  0x6d   :  { %4513 = vsyncadd [#allocation12], 4294965248  ;;  %v4527_v0 = vmov 0.0   ;;  %vm4528_vm0 = vmmov 0   ;;  %v3947_v1 = vld [vmem:[#allocation5] sm:$0xff]   ;;  %v112_v2 = vld [vmem:[#allocation2] sm:$0xff] }
  0x6e   :  { %3898 = vmatprep.subr.bf16.mxu0 %v4527_v0  ;;  %3900 = vmatprep.mubr.msk.bf16.mxu0 %vm4528_vm0, %v4527_v0  ;;  %v175_v3 = vld [vmem:[#allocation7] sm:$0xff]  ;;  %v113_v5 = vpack.c.bf16 %v112_v2, %v112_v2  ;;  %vm129_vm1 = vcmask 130048   ;;  %v177_v8 = vld [vmem:[#allocation7 + $0x10] sm:$0xff]  ;;  %s4530_s21 = smov [#allocation13]  }
  0x6f   :  { %v183_v4 = vld [vmem:[#allocation7 + $0x40] sm:$0xff]  ;;  %3899 = vmatpush3.bf16.msra.mxu0 %v3947_v1  ;;  %v185_v9 = vld [vmem:[#allocation7 + $0x50] sm:$0xff]  ;;  %s3458_s22 = sshll.u32 %s4530_s21, 4  ;;  %s3459_s22 = int_to_ptr.vmem [resolvable:$true] %s3458_s22 }
  0x70   :  { %v3473_v6 = vcombine.low %v175_v3, %v183_v4  ;;  %v3474_v7 = vcombine.high %v175_v3, %v183_v4  ;;  %v191_v10 = vld [vmem:[#allocation7 + $0x80] sm:$0xff]  ;;  %v3478_v11 = vcombine.high %v177_v8, %v185_v9  ;;  %v3477_v12 = vcombine.low %v177_v8, %v185_v9  ;;  %v193_v14 = vld [vmem:[#allocation7 + $0x90] sm:$0xff]  ;;  %v176_v4 = vld [vmem:[#allocation7 + $0x8] sm:$0xff]  ;;  %p4489_p7 = scmp.lt.s32.totalorder %s3459_s22, %s3459_s22 }
  0x71   :  { %v199_v13 = vld [vmem:[#allocation7 + $0xc0] sm:$0xff]  ;;  %v201_v15 = vld [vmem:[#allocation7 + $0xd0] sm:$0xff] }
  0x72   :  { %1027 = vmatprep.subr.bf16.mxu0 %v3474_v7  ;;  %v3490_v16 = vcombine.high %v191_v10, %v199_v13  ;;  %v3494_v17 = vcombine.high %v193_v14, %v201_v15  ;;  %v207_v18 = vld [vmem:[#allocation7 + $0x100] sm:$0xff]  ;;  %v209_v20 = vld [vmem:[#allocation7 + $0x110] sm:$0xff]  ;;  %3901 = vmatmul.mubr.msk.bf16.vlgmr.msra.gmra.mrb[0].mxu0 %vm129_vm1, %v113_v5  ;;  %v3489_v22 = vcombine.low %v191_v10, %v199_v13  ;;  %v184_v5 = vld [vmem:[#allocation7 + $0x48] sm:$0xff] }
  0x73   :  { %v215_v19 = vld [vmem:[#allocation7 + $0x140] sm:$0xff]  ;;  %1109 = vmatprep.subr.bf16.mxu1 %v3478_v11  ;;  %v217_v21 = vld [vmem:[#allocation7 + $0x150] sm:$0xff]  ;;  %1028 = vmatpush1.bf16.msra.mxu0 %v3473_v6  ;;  %v3493_v23 = vcombine.low %v193_v14, %v201_v15  ;;  %v3476_v7 = vcombine.high %v176_v4, %v184_v5  ;;  %v3475_v9 = vcombine.low %v176_v4, %v184_v5  ;;  %v296_v4 = vld [vmem:[#allocation7 + $0x3c8] sm:$0xff] }
  0x74   :  { %1110 = vmatpush1.bf16.msra.mxu1 %v3477_v12  ;;  %1029 = vmatprep.subr.bf16.mxu0 %v3490_v16  ;;  %v3506_v24 = vcombine.high %v207_v18, %v215_v19  ;;  %v3510_v25 = vcombine.high %v209_v20, %v217_v21  ;;  %v223_v26 = vld [vmem:[#allocation7 + $0x180] sm:$0xff]  ;;  %v225_v28 = vld [vmem:[#allocation7 + $0x190] sm:$0xff]  ;;  %v3505_v30 = vcombine.low %v207_v18, %v215_v19  ;;  %v4529_v12 = vmov 0   ;;  %v200_v19 = vld [vmem:[#allocation7 + $0xc8] sm:$0xff] }
  0x75   :  { %1111 = vmatprep.subr.bf16.mxu1 %v3494_v17  ;;  %v231_v27 = vld [vmem:[#allocation7 + $0x1c0] sm:$0xff]  ;;  %v233_v29 = vld [vmem:[#allocation7 + $0x1d0] sm:$0xff]  ;;  %v3509_v31 = vcombine.low %v209_v20, %v217_v21  ;;  %1059 = vmatprep.mubr.bf16.mxu0 %v4529_v12  ;;  %v192_v17 = vld [vmem:[#allocation7 + $0x88] sm:$0xff] }
  0x76   :  { %v239_v32 = vld [vmem:[#allocation7 + $0x200] sm:$0xff]  ;;  %v241_v34 = vld [vmem:[#allocation7 + $0x210] sm:$0xff]  ;;  %v3522_v36 = vcombine.high %v223_v26, %v231_v27  ;;  %v3526_v37 = vcombine.high %v225_v28, %v233_v29  ;;  %v3521_v38 = vcombine.low %v223_v26, %v231_v27  ;;  %v3525_v39 = vcombine.low %v225_v28, %v233_v29  ;;  %1141 = vmatprep.mubr.bf16.mxu1 %v4529_v12  ;;  %v208_v27 = vld [vmem:[#allocation7 + $0x108] sm:$0xff] }
  0x77   :  { %1030 = vmatpush1.bf16.msra.mxu0 %v3489_v22  ;;  %v247_v33 = vld [vmem:[#allocation7 + $0x240] sm:$0xff]  ;;  %v249_v35 = vld [vmem:[#allocation7 + $0x250] sm:$0xff]  ;;  %v216_v28 = vld [vmem:[#allocation7 + $0x148] sm:$0xff] }
  0x78   :  { %1112 = vmatpush1.bf16.msra.mxu1 %v3493_v23  ;;  %1031 = vmatprep.subr.bf16.mxu0 %v3506_v24  ;;  %v255_v40 = vld [vmem:[#allocation7 + $0x280] sm:$0xff]  ;;  %v257_v42 = vld [vmem:[#allocation7 + $0x290] sm:$0xff]  ;;  %v3538_v44 = vcombine.high %v239_v32, %v247_v33  ;;  %v3542_v45 = vcombine.high %v241_v34, %v249_v35  ;;  %v3537_v46 = vcombine.low %v239_v32, %v247_v33 }
  0x79   :  { %1113 = vmatprep.subr.bf16.mxu1 %v3510_v25  ;;  %v263_v41 = vld [vmem:[#allocation7 + $0x2c0] sm:$0xff]  ;;  %v265_v43 = vld [vmem:[#allocation7 + $0x2d0] sm:$0xff]  ;;  %v3541_v47 = vcombine.low %v241_v34, %v249_v35  ;;  %v3492_v25 = vcombine.high %v192_v17, %v200_v19  ;;  %v3508_v33 = vcombine.high %v208_v27, %v216_v28  ;;  %v224_v35 = vld [vmem:[#allocation7 + $0x188] sm:$0xff] }
  0x7a   :  { %v271_v48 = vld [vmem:[#allocation7 + $0x300] sm:$0xff]  ;;  %v273_v50 = vld [vmem:[#allocation7 + $0x310] sm:$0xff]  ;;  %v3554_v52 = vcombine.high %v255_v40, %v263_v41  ;;  %v3558_v53 = vcombine.high %v257_v42, %v265_v43  ;;  %v3553_v54 = vcombine.low %v255_v40, %v263_v41  ;;  %v3557_v55 = vcombine.low %v257_v42, %v265_v43  ;;  %v240_v43 = vld [vmem:[#allocation7 + $0x208] sm:$0xff] }
  0x7b   :  { %1032 = vmatpush1.bf16.msra.mxu0 %v3505_v30  ;;  %v279_v49 = vld [vmem:[#allocation7 + $0x340] sm:$0xff]  ;;  %v281_v51 = vld [vmem:[#allocation7 + $0x350] sm:$0xff] }
  0x7c   :  { %1114 = vmatpush1.bf16.msra.mxu1 %v3509_v31  ;;  %1033 = vmatprep.subr.bf16.mxu0 %v3522_v36  ;;  %v3570_v56 = vcombine.high %v271_v48, %v279_v49  ;;  %v3574_v57 = vcombine.high %v273_v50, %v281_v51  ;;  %v3569_v58 = vcombine.low %v271_v48, %v279_v49  ;;  %v287_v60 = vld [vmem:[#allocation7 + $0x380] sm:$0xff]  ;;  %v289_v62 = vld [vmem:[#allocation7 + $0x390] sm:$0xff]  ;;  %v232_v36 = vld [vmem:[#allocation7 + $0x1c8] sm:$0xff] }
  0x7d   :  { %1115 = vmatprep.subr.bf16.mxu1 %v3526_v37  ;;  %v3573_v59 = vcombine.low %v273_v50, %v281_v51  ;;  %v295_v61 = vld [vmem:[#allocation7 + $0x3c0] sm:$0xff]  ;;  %v297_v0 = vld [vmem:[#allocation7 + $0x3d0] sm:$0xff]  ;;  %v3491_v31 = vcombine.low %v192_v17, %v200_v19  ;;  %v3524_v41 = vcombine.high %v224_v35, %v232_v36  ;;  %v256_v51 = vld [vmem:[#allocation7 + $0x288] sm:$0xff] }
  0x7e   :  { %v3586_v63 = vcombine.high %v287_v60, %v295_v61  ;;  %v3585_v1 = vcombine.low %v287_v60, %v295_v61  ;;  %v3590_v2 = vcombine.high %v289_v62, %v297_v0  ;;  %v3589_v3 = vcombine.low %v289_v62, %v297_v0  ;;  %v179_v6 = vld [vmem:[#allocation7 + $0x20] sm:$0xff]  ;;  %v3470_v13 = vld [vmem:[%s4789_s2] ss:$0 sm:$0xff]  ;;  %v280_v60 = vld [vmem:[#allocation7 + $0x348] sm:$0xff] }
  0x7f   :  { %1034 = vmatpush1.bf16.msra.mxu0 %v3521_v38  ;;  %v187_v8 = vld [vmem:[#allocation7 + $0x60] sm:$0xff] }
  0x80   :  { %1116 = vmatpush1.bf16.msra.mxu1 %v3525_v39  ;;  %1035 = vmatprep.subr.bf16.mxu0 %v3538_v44  ;;  %v3481_v10 = vcombine.low %v179_v6, %v187_v8  ;;  %v3482_v11 = vcombine.high %v179_v6, %v187_v8  ;;  %v195_v20 = vld [vmem:[#allocation7 + $0xa0] sm:$0xff]  ;;  %v3507_v39 = vcombine.low %v208_v27, %v216_v28  ;;  %v248_v44 = vld [vmem:[#allocation7 + $0x248] sm:$0xff] }
  0x81   :  { %1117 = vmatprep.subr.bf16.mxu1 %v3542_v45  ;;  %v203_v21 = vld [vmem:[#allocation7 + $0xe0] sm:$0xff]  ;;  %v3540_v49 = vcombine.high %v240_v43, %v248_v44 }
  0x82   :  { %v3498_v26 = vcombine.high %v195_v20, %v203_v21  ;;  %v211_v29 = vld [vmem:[#allocation7 + $0x120] sm:$0xff]  ;;  %v3497_v32 = vcombine.low %v195_v20, %v203_v21  ;;  %v194_v20 = vld [vmem:[#allocation7 + $0x98] sm:$0xff] }
  0x83   :  { %1036 = vmatpush1.bf16.msra.mxu0 %v3537_v46  ;;  %v219_v30 = vld [vmem:[#allocation7 + $0x160] sm:$0xff]  ;;  %v202_v21 = vld [vmem:[#allocation7 + $0xd8] sm:$0xff] }
  0x84   :  { %1118 = vmatpush1.bf16.msra.mxu1 %v3541_v47  ;;  %1037 = vmatprep.subr.bf16.mxu0 %v3554_v52  ;;  %v3514_v34 = vcombine.high %v211_v29, %v219_v30  ;;  %v227_v37 = vld [vmem:[#allocation7 + $0x1a0] sm:$0xff]  ;;  %v3513_v40 = vcombine.low %v211_v29, %v219_v30  ;;  %v3523_v47 = vcombine.low %v224_v35, %v232_v36  ;;  %v264_v52 = vld [vmem:[#allocation7 + $0x2c8] sm:$0xff]  ;;  %v210_v29 = vld [vmem:[#allocation7 + $0x118] sm:$0xff] }
  0x85   :  { %1119 = vmatprep.subr.bf16.mxu1 %v3558_v53  ;;  %v235_v38 = vld [vmem:[#allocation7 + $0x1e0] sm:$0xff]  ;;  %v3496_v27 = vcombine.high %v194_v20, %v202_v21  ;;  %v218_v30 = vld [vmem:[#allocation7 + $0x158] sm:$0xff] }
  0x86   :  { %v3530_v42 = vcombine.high %v227_v37, %v235_v38  ;;  %v243_v45 = vld [vmem:[#allocation7 + $0x220] sm:$0xff]  ;;  %v3529_v48 = vcombine.low %v227_v37, %v235_v38  ;;  %v3512_v35 = vcombine.high %v210_v29, %v218_v30  ;;  %v226_v37 = vld [vmem:[#allocation7 + $0x198] sm:$0xff] }
  0x87   :  { %1038 = vmatpush1.bf16.msra.mxu0 %v3553_v54  ;;  %v251_v46 = vld [vmem:[#allocation7 + $0x260] sm:$0xff]  ;;  %v234_v38 = vld [vmem:[#allocation7 + $0x1d8] sm:$0xff] }
  0x88   :  { %1120 = vmatpush1.bf16.msra.mxu1 %v3557_v55  ;;  %1039 = vmatprep.subr.bf16.mxu0 %v3570_v56  ;;  %v3546_v50 = vcombine.high %v243_v45, %v251_v46  ;;  %v259_v53 = vld [vmem:[#allocation7 + $0x2a0] sm:$0xff]  ;;  %v3539_v55 = vcombine.low %v240_v43, %v248_v44  ;;  %v3545_v56 = vcombine.low %v243_v45, %v251_v46  ;;  %v242_v45 = vld [vmem:[#allocation7 + $0x218] sm:$0xff] }
  0x89   :  { %1121 = vmatprep.subr.bf16.mxu1 %v3574_v57  ;;  %v267_v54 = vld [vmem:[#allocation7 + $0x2e0] sm:$0xff]  ;;  %v3556_v57 = vcombine.high %v256_v51, %v264_v52  ;;  %v3528_v43 = vcombine.high %v226_v37, %v234_v38  ;;  %v250_v46 = vld [vmem:[#allocation7 + $0x258] sm:$0xff] }
  0x8a   :  { %v275_v61 = vld [vmem:[#allocation7 + $0x320] sm:$0xff]  ;;  %v3561_v0 = vcombine.low %v259_v53, %v267_v54 }
  0x8b   :  { %1040 = vmatpush1.bf16.msra.mxu0 %v3569_v58  ;;  %v3562_v58 = vcombine.high %v259_v53, %v267_v54  ;;  %v283_v62 = vld [vmem:[#allocation7 + $0x360] sm:$0xff]  ;;  %v258_v53 = vld [vmem:[#allocation7 + $0x298] sm:$0xff] }
  0x8c   :  { %1122 = vmatpush1.bf16.msra.mxu1 %v3573_v59  ;;  %1041 = vmatprep.subr.bf16.mxu0 %v3586_v63  ;;  %v272_v59 = vld [vmem:[#allocation7 + $0x308] sm:$0xff]  ;;  %v3555_v63 = vcombine.low %v256_v51, %v264_v52  ;;  %v291_v5 = vld [vmem:[#allocation7 + $0x3a0] sm:$0xff]  ;;  %v3577_v8 = vcombine.low %v275_v61, %v283_v62  ;;  %v3544_v51 = vcombine.high %v242_v45, %v250_v46  ;;  %v266_v54 = vld [vmem:[#allocation7 + $0x2d8] sm:$0xff] }
  0x8d   :  { %1123 = vmatprep.subr.bf16.mxu1 %v3590_v2  ;;  %v3578_v2 = vcombine.high %v275_v61, %v283_v62  ;;  %v299_v6 = vld [vmem:[#allocation7 + $0x3e0] sm:$0xff]  ;;  %v274_v61 = vld [vmem:[#allocation7 + $0x318] sm:$0xff] }
  0x8e   :  { %v3593_v17 = vcombine.low %v291_v5, %v299_v6  ;;  %v282_v62 = vld [vmem:[#allocation7 + $0x358] sm:$0xff] }
  0x8f   :  { %1042 = vmatpush1.bf16.msra.mxu0 %v3585_v1  ;;  %v3572_v1 = vcombine.high %v272_v59, %v280_v60 }
  0x90   :  { %1124 = vmatpush1.bf16.msra.mxu1 %v3589_v3  ;;  %1068 = vmatprep.subr.bf16.mxu0 %v3476_v7  ;;  %v288_v3 = vld [vmem:[#allocation7 + $0x388] sm:$0xff]  ;;  %v3571_v7 = vcombine.low %v272_v59, %v280_v60  ;;  %v3560_v59 = vcombine.high %v258_v53, %v266_v54 }
  0x91   :  { %1191 = vmatprep.subr.bf16.mxu1 %v3482_v11  ;;  %v178_v11 = vld [vmem:[#allocation7 + $0x18] sm:$0xff] }
 0x145   :  { %v167_v14 = vpop.f32.mrb[0].mxu0 }
 0x146   :  { %v168_v15 = vadd.f32 %v3470_v13, %v167_v14  ;;  %v3902_v16 = vpop.f32.mrb[1].mxu0  ;;  %v186_v13 = vld [vmem:[#allocation7 + $0x58] sm:$0xff]  ;;  %v181_v14 = vld [vmem:[#allocation7 + $0x30] sm:$0xff] }
 0x147   :  { %v170_v18 = vpop.f32.mrb[2].mxu0  ;;  %v3587_v16 = vcombine.low %v288_v3, %v296_v4 }
 0x148   :  { %v173_v22 = vmax.f32 %v168_v15, 0.0  ;;  %v3903_v23 = vpop.f32.mrb[3].mxu0  ;;  %v189_v15 = vld [vmem:[#allocation7 + $0x70] sm:$0xff]  ;;  %v3480_v18 = vcombine.high %v178_v11, %v186_v13 }
 0x149   :  { %v3486_v19 = vcombine.high %v181_v14, %v189_v15  ;;  %v205_v23 = vld [vmem:[#allocation7 + $0xf0] sm:$0xff] }
 0x14a   :  { %v4666_v24 = vpack.c.bf16 %v173_v22, %v173_v22  ;;  %v197_v22 = vld [vmem:[#allocation7 + $0xb0] sm:$0xff] }
 0x14b   :  { %v3502_v28 = vcombine.high %v197_v22, %v205_v23 }
 0x14c   :  { %1060 = vmatmul.mubr.bf16.vlgmr.msra.gmra.mrb[4].mxu0 %v4666_v24  ;;  %1142 = vmatmul.mubr.bf16.vlgmr.msra.gmra.mrb[0].mxu1 %v4666_v24 }
 0x14d   :  { %1069 = vmatpush1.bf16.msra.mxu0 %v3475_v9  ;;  %1192 = vmatpush1.bf16.msra.mxu1 %v3481_v10  ;;  %v3588_v9 = vcombine.high %v288_v3, %v296_v4  ;;  %v3594_v10 = vcombine.high %v291_v5, %v299_v6  ;;  %v3576_v3 = vcombine.high %v274_v61, %v282_v62  ;;  %v290_v5 = vld [vmem:[#allocation7 + $0x398] sm:$0xff] }
 0x14e   :  { %1070 = vmatprep.subr.bf16.mxu0 %v3492_v25  ;;  %1193 = vmatprep.subr.bf16.mxu1 %v3498_v26  ;;  %v3479_v25 = vcombine.low %v178_v11, %v186_v13  ;;  %v3485_v26 = vcombine.low %v181_v14, %v189_v15  ;;  %v298_v6 = vld [vmem:[#allocation7 + $0x3d8] sm:$0xff]  ;;  %v180_v14 = vld [vmem:[#allocation7 + $0x28] sm:$0xff] }
 0x14f   :  { %1100 = vmatprep.mubr.bf16.mxu0 %v4529_v12  ;;  %1223 = vmatprep.mubr.bf16.mxu1 %v4529_v12  ;;  %v3592_v11 = vcombine.high %v290_v5, %v298_v6  ;;  %v188_v15 = vld [vmem:[#allocation7 + $0x68] sm:$0xff] }
 0x151   :  { %1071 = vmatpush1.bf16.msra.mxu0 %v3491_v31  ;;  %1194 = vmatpush1.bf16.msra.mxu1 %v3497_v32  ;;  %v213_v31 = vld [vmem:[#allocation7 + $0x130] sm:$0xff] }
 0x152   :  { %1072 = vmatprep.subr.bf16.mxu0 %v3508_v33  ;;  %1195 = vmatprep.subr.bf16.mxu1 %v3514_v34  ;;  %v221_v32 = vld [vmem:[#allocation7 + $0x170] sm:$0xff]  ;;  %v3495_v33 = vcombine.low %v194_v20, %v202_v21  ;;  %v3501_v34 = vcombine.low %v197_v22, %v205_v23  ;;  %v204_v20 = vld [vmem:[#allocation7 + $0xe8] sm:$0xff]  ;;  %v3483_v21 = vcombine.low %v180_v14, %v188_v15 }
 0x153   :  { %v3518_v36 = vcombine.high %v213_v31, %v221_v32  ;;  %v212_v23 = vld [vmem:[#allocation7 + $0x128] sm:$0xff] }
 0x155   :  { %1073 = vmatpush1.bf16.msra.mxu0 %v3507_v39  ;;  %1196 = vmatpush1.bf16.msra.mxu1 %v3513_v40  ;;  %v229_v39 = vld [vmem:[#allocation7 + $0x1b0] sm:$0xff] }
 0x156   :  { %1074 = vmatprep.subr.bf16.mxu0 %v3524_v41  ;;  %1197 = vmatprep.subr.bf16.mxu1 %v3530_v42  ;;  %v237_v40 = vld [vmem:[#allocation7 + $0x1f0] sm:$0xff]  ;;  %v3511_v41 = vcombine.low %v210_v29, %v218_v30  ;;  %v3517_v42 = vcombine.low %v213_v31, %v221_v32  ;;  %v236_v29 = vld [vmem:[#allocation7 + $0x1e8] sm:$0xff] }
 0x157   :  { %v3534_v44 = vcombine.high %v229_v39, %v237_v40  ;;  %v244_v32 = vld [vmem:[#allocation7 + $0x228] sm:$0xff] }
 0x159   :  { %1075 = vmatpush1.bf16.msra.mxu0 %v3523_v47  ;;  %1198 = vmatpush1.bf16.msra.mxu1 %v3529_v48  ;;  %v245_v47 = vld [vmem:[#allocation7 + $0x230] sm:$0xff] }
 0x15a   :  { %1076 = vmatprep.subr.bf16.mxu0 %v3540_v49  ;;  %1199 = vmatprep.subr.bf16.mxu1 %v3546_v50  ;;  %v253_v48 = vld [vmem:[#allocation7 + $0x270] sm:$0xff]  ;;  %v3527_v49 = vcombine.low %v226_v37, %v234_v38  ;;  %v3533_v50 = vcombine.low %v229_v39, %v237_v40  ;;  %v268_v37 = vld [vmem:[#allocation7 + $0x2e8] sm:$0xff] }
 0x15b   :  { %v3550_v52 = vcombine.high %v245_v47, %v253_v48  ;;  %v276_v40 = vld [vmem:[#allocation7 + $0x328] sm:$0xff] }
 0x15d   :  { %1077 = vmatpush1.bf16.msra.mxu0 %v3539_v55  ;;  %1200 = vmatpush1.bf16.msra.mxu1 %v3545_v56  ;;  %v261_v55 = vld [vmem:[#allocation7 + $0x2b0] sm:$0xff] }
 0x15e   :  { %1078 = vmatprep.subr.bf16.mxu0 %v3556_v57  ;;  %1201 = vmatprep.subr.bf16.mxu1 %v3562_v58  ;;  %v269_v56 = vld [vmem:[#allocation7 + $0x2f0] sm:$0xff]  ;;  %v3543_v57 = vcombine.low %v242_v45, %v250_v46  ;;  %v3549_v58 = vcombine.low %v245_v47, %v253_v48  ;;  %v300_v45 = vld [vmem:[#allocation7 + $0x3e8] sm:$0xff]  ;;  %v182_v48 = vld [vmem:[#allocation7 + $0x38] sm:$0xff] }
 0x15f   :  { %v3566_v60 = vcombine.high %v261_v55, %v269_v56 }
 0x161   :  { %1079 = vmatpush1.bf16.msra.mxu0 %v3555_v63  ;;  %1202 = vmatpush1.bf16.msra.mxu1 %v3561_v0  ;;  %v277_v63 = vld [vmem:[#allocation7 + $0x330] sm:$0xff] }
 0x162   :  { %1080 = vmatprep.subr.bf16.mxu0 %v3572_v1  ;;  %1203 = vmatprep.subr.bf16.mxu1 %v3578_v2  ;;  %v285_v0 = vld [vmem:[#allocation7 + $0x370] sm:$0xff]  ;;  %v3559_v1 = vcombine.low %v258_v53, %v266_v54  ;;  %v3565_v2 = vcombine.low %v261_v55, %v269_v56  ;;  %v198_v54 = vld [vmem:[#allocation7 + $0xb8] sm:$0xff] }
 0x163   :  { %v3582_v4 = vcombine.high %v277_v63, %v285_v0  ;;  %v206_v55 = vld [vmem:[#allocation7 + $0xf8] sm:$0xff] }
 0x165   :  { %1081 = vmatpush1.bf16.msra.mxu0 %v3571_v7  ;;  %1204 = vmatpush1.bf16.msra.mxu1 %v3577_v8  ;;  %v293_v7 = vld [vmem:[#allocation7 + $0x3b0] sm:$0xff] }
 0x166   :  { %1082 = vmatprep.subr.bf16.mxu0 %v3588_v9  ;;  %1205 = vmatprep.subr.bf16.mxu1 %v3594_v10  ;;  %v301_v8 = vld [vmem:[#allocation7 + $0x3f0] sm:$0xff]  ;;  %v3575_v9 = vcombine.low %v274_v61, %v282_v62  ;;  %v3581_v10 = vcombine.low %v277_v63, %v285_v0  ;;  %v222_v61 = vld [vmem:[#allocation7 + $0x178] sm:$0xff]  ;;  %v3503_v62 = vcombine.low %v198_v54, %v206_v55 }
 0x167   :  { %v3598_v13 = vcombine.high %v293_v7, %v301_v8  ;;  %v4008_v63 = vld [vmem:[#allocation10 + $0x320] ss:$8 sps:$4 sm:$0xff]   ;;  %v4010_v0 = vld [vmem:[#allocation10 + $0x324] ss:$8 sps:$4 sm:$0xff]  }
 0x169   :  { %1083 = vmatpush1.bf16.msra.mxu0 %v3587_v16  ;;  %1206 = vmatpush1.bf16.msra.mxu1 %v3593_v17  ;;  %v3591_v16 = vcombine.low %v290_v5, %v298_v6  ;;  %v3597_v17 = vcombine.low %v293_v7, %v301_v8  ;;  %v4014_v5 = vld [vmem:[#allocation10 + $0x330] ss:$8 sps:$4 sm:$0xff]   ;;  %v4016_v6 = vld [vmem:[#allocation10 + $0x334] ss:$8 sps:$4 sm:$0xff]   ;;  %v246_v8 = vld [vmem:[#allocation7 + $0x238] sm:$0xff] }
 0x16a   :  { %1150 = vmatprep.subr.bf16.mxu0 %v3480_v18  ;;  %1273 = vmatprep.subr.bf16.mxu1 %v3486_v19  ;;  %v3484_v18 = vcombine.high %v180_v14, %v188_v15  ;;  %v196_v19 = vld [vmem:[#allocation7 + $0xa8] sm:$0xff]  ;;  %v262_v14 = vld [vmem:[#allocation7 + $0x2b8] sm:$0xff] }
 0x16b   :  { %v3500_v22 = vcombine.high %v196_v19, %v204_v20  ;;  %v270_v15 = vld [vmem:[#allocation7 + $0x2f8] sm:$0xff] }
 0x16c   :  { %1101 = vmatmul.mubr.bf16.vlgmr.msra.gmra.mrb[8].mxu0 %v4666_v24  ;;  %1224 = vmatmul.mubr.bf16.vlgmr.msra.gmra.mrb[4].mxu1 %v4666_v24 }
 0x16d   :  { %1151 = vmatpush1.bf16.msra.mxu0 %v3479_v25  ;;  %1274 = vmatpush1.bf16.msra.mxu1 %v3485_v26  ;;  %v220_v25 = vld [vmem:[#allocation7 + $0x168] sm:$0xff]  ;;  %v3499_v26 = vcombine.low %v196_v19, %v204_v20  ;;  %v3568_v19 = vcombine.high %v262_v14, %v270_v15  ;;  %v278_v20 = vld [vmem:[#allocation7 + $0x338] sm:$0xff] }
 0x16e   :  { %1152 = vmatprep.subr.bf16.mxu0 %v3496_v27  ;;  %1275 = vmatprep.subr.bf16.mxu1 %v3502_v28  ;;  %v3516_v27 = vcombine.high %v212_v23, %v220_v25  ;;  %v228_v28 = vld [vmem:[#allocation7 + $0x1a8] sm:$0xff]  ;;  %v3515_v30 = vcombine.low %v212_v23, %v220_v25  ;;  %v4034_v23 = vld [vmem:[#allocation10 + $0x364] ss:$8 sps:$4 sm:$0xff]  }
 0x16f   :  { %1182 = vmatprep.mubr.bf16.mxu0 %v4529_v12  ;;  %1305 = vmatprep.mubr.bf16.mxu1 %v4529_v12  ;;  %v3532_v31 = vcombine.high %v228_v28, %v236_v29 }
 0x171   :  { %1153 = vmatpush1.bf16.msra.mxu0 %v3495_v33  ;;  %1276 = vmatpush1.bf16.msra.mxu1 %v3501_v34  ;;  %v252_v33 = vld [vmem:[#allocation7 + $0x268] sm:$0xff]  ;;  %v3531_v34 = vcombine.low %v228_v28, %v236_v29  ;;  %v302_v28 = vld [vmem:[#allocation7 + $0x3f8] sm:$0xff] }
 0x172   :  { %1154 = vmatprep.subr.bf16.mxu0 %v3512_v35  ;;  %1277 = vmatprep.subr.bf16.mxu1 %v3518_v36  ;;  %v3548_v35 = vcombine.high %v244_v32, %v252_v33  ;;  %v260_v36 = vld [vmem:[#allocation7 + $0x2a8] sm:$0xff]  ;;  %v3547_v38 = vcombine.low %v244_v32, %v252_v33 }
 0x173   :  { %v3564_v39 = vcombine.high %v260_v36, %v268_v37  ;;  %v4038_v32 = vld [vmem:[#allocation10 + $0x370] ss:$8 sps:$4 sm:$0xff]  }
 0x175   :  { %1155 = vmatpush1.bf16.msra.mxu0 %v3511_v41  ;;  %1278 = vmatpush1.bf16.msra.mxu1 %v3517_v42  ;;  %v284_v41 = vld [vmem:[#allocation7 + $0x368] sm:$0xff]  ;;  %v3563_v42 = vcombine.low %v260_v36, %v268_v37  ;;  %v4044_v36 = vld [vmem:[#allocation10 + $0x380] ss:$8 sps:$4 sm:$0xff]  }
 0x176   :  { %1156 = vmatprep.subr.bf16.mxu0 %v3528_v43  ;;  %1279 = vmatprep.subr.bf16.mxu1 %v3534_v44  ;;  %v3580_v43 = vcombine.high %v276_v40, %v284_v41  ;;  %v292_v44 = vld [vmem:[#allocation7 + $0x3a8] sm:$0xff]  ;;  %v3579_v46 = vcombine.low %v276_v40, %v284_v41  ;;  %v3948_v37 = vld [vmem:[#allocation10] ss:$8 sps:$4 sm:$0xff]  }
 0x177   :  { %v3596_v47 = vcombine.high %v292_v44, %v300_v45  ;;  %v3953_v40 = vld [vmem:[#allocation10 + $0x14] ss:$8 sps:$4 sm:$0xff]   ;;  %v3951_v41 = vld [vmem:[#allocation10 + $0x10] ss:$8 sps:$4 sm:$0xff]  }
 0x179   :  { %1157 = vmatpush1.bf16.msra.mxu0 %v3527_v49  ;;  %1280 = vmatpush1.bf16.msra.mxu1 %v3533_v50  ;;  %v190_v49 = vld [vmem:[#allocation7 + $0x78] sm:$0xff]  ;;  %v3595_v50 = vcombine.low %v292_v44, %v300_v45 }
 0x17a   :  { %1158 = vmatprep.subr.bf16.mxu0 %v3544_v51  ;;  %1281 = vmatprep.subr.bf16.mxu1 %v3550_v52  ;;  %v3996_v51 = vld [vmem:[#allocation10 + $0x300] ss:$8 sps:$4 sm:$0xff]   ;;  %v3998_v52 = vld [vmem:[#allocation10 + $0x304] ss:$8 sps:$4 sm:$0xff]   ;;  %v3488_v53 = vcombine.high %v182_v48, %v190_v49  ;;  %v3487_v56 = vcombine.low %v182_v48, %v190_v49  ;;  %v3959_v48 = vld [vmem:[#allocation10 + $0x34] ss:$8 sps:$4 sm:$0xff]  }
 0x17b   :  { %v3956_v44 = vld [vmem:[#allocation10 + $0x24] ss:$8 sps:$4 sm:$0xff]   ;;  %v3954_v45 = vld [vmem:[#allocation10 + $0x20] ss:$8 sps:$4 sm:$0xff]   ;;  %v3957_v49 = vld [vmem:[#allocation10 + $0x30] ss:$8 sps:$4 sm:$0xff]  }
 0x17d   :  { %1159 = vmatpush1.bf16.msra.mxu0 %v3543_v57  ;;  %1282 = vmatpush1.bf16.msra.mxu1 %v3549_v58  ;;  %v4002_v57 = vld [vmem:[#allocation10 + $0x310] ss:$8 sps:$4 sm:$0xff]   ;;  %v4004_v58 = vld [vmem:[#allocation10 + $0x314] ss:$8 sps:$4 sm:$0xff]  }
 0x17e   :  { %1160 = vmatprep.subr.bf16.mxu0 %v3560_v59  ;;  %1283 = vmatprep.subr.bf16.mxu1 %v3566_v60  ;;  %v3504_v59 = vcombine.high %v198_v54, %v206_v55  ;;  %v214_v60 = vld [vmem:[#allocation7 + $0x138] sm:$0xff]  ;;  %v4076_v54 = vld [vmem:[#allocation10 + $0x3d4] ss:$8 sps:$4 sm:$0xff]  }
 0x17f   :  { %v3965_v55 = vld [vmem:[#allocation10 + $0x54] ss:$8 sps:$4 sm:$0xff]  }
 0x181   :  { %1161 = vmatpush1.bf16.msra.mxu0 %v3559_v1  ;;  %1284 = vmatpush1.bf16.msra.mxu1 %v3565_v2  ;;  %v3520_v1 = vcombine.high %v214_v60, %v222_v61  ;;  %v230_v2 = vld [vmem:[#allocation7 + $0x1b8] sm:$0xff] }
 0x182   :  { %1162 = vmatprep.subr.bf16.mxu0 %v3576_v3  ;;  %1285 = vmatprep.subr.bf16.mxu1 %v3582_v4  ;;  %v238_v3 = vld [vmem:[#allocation7 + $0x1f8] sm:$0xff]  ;;  %v3519_v4 = vcombine.low %v214_v60, %v222_v61  ;;  %v4088_v61 = vld [vmem:[#allocation10 + $0x3f4] ss:$8 sps:$4 sm:$0xff]  }
 0x183   :  { %v3536_v7 = vcombine.high %v230_v2, %v238_v3  ;;  %v3966_v60 = vld [vmem:[#allocation10 + $0x60] ss:$8 sps:$4 sm:$0xff]  }
 0x185   :  { %1163 = vmatpush1.bf16.msra.mxu0 %v3575_v9  ;;  %1286 = vmatpush1.bf16.msra.mxu1 %v3581_v10  ;;  %v254_v9 = vld [vmem:[#allocation7 + $0x278] sm:$0xff] }
 0x186   :  { %1164 = vmatprep.subr.bf16.mxu0 %v3592_v11  ;;  %1287 = vmatprep.subr.bf16.mxu1 %v3598_v13  ;;  %v4020_v10 = vld [vmem:[#allocation10 + $0x340] ss:$8 sps:$4 sm:$0xff]   ;;  %v4022_v11 = vld [vmem:[#allocation10 + $0x344] ss:$8 sps:$4 sm:$0xff]   ;;  %v3552_v13 = vcombine.high %v246_v8, %v254_v9 }
 0x189   :  { %1165 = vmatpush1.bf16.msra.mxu0 %v3591_v16  ;;  %1288 = vmatpush1.bf16.msra.mxu1 %v3597_v17  ;;  %v3551_v16 = vcombine.low %v246_v8, %v254_v9  ;;  %v4026_v17 = vld [vmem:[#allocation10 + $0x350] ss:$8 sps:$4 sm:$0xff]   ;;  %v3983_v8 = vld [vmem:[#allocation10 + $0xb4] ss:$8 sps:$4 sm:$0xff]  }
 0x18a   :  { %1232 = vmatprep.subr.bf16.mxu0 %v3484_v18  ;;  %3058 = vmatprep.subr.bf16.mxu1 %v3998_v52  ;;  %v4028_v18 = vld [vmem:[#allocation10 + $0x354] ss:$8 sps:$4 sm:$0xff]   ;;  %v3960_v52 = vld [vmem:[#allocation10 + $0x40] ss:$8 sps:$4 sm:$0xff]   ;;  %v3981_v9 = vld [vmem:[#allocation10 + $0xb0] ss:$8 sps:$4 sm:$0xff]  }
 0x18c   :  { %1183 = vmatmul.mubr.bf16.vlgmr.msra.gmra.mrb[12].mxu0 %v4666_v24  ;;  %1306 = vmatmul.mubr.bf16.vlgmr.msra.gmra.mrb[8].mxu1 %v4666_v24 }
 0x18d   :  { %1233 = vmatpush1.bf16.msra.mxu0 %v3483_v21  ;;  %1264 = vmatprep.mubr.bf16.mxu0 %v4529_v12  ;;  %v286_v21 = vld [vmem:[#allocation7 + $0x378] sm:$0xff] }
 0x18e   :  { %1234 = vmatprep.subr.bf16.mxu0 %v3500_v22  ;;  %3059 = vmatpush1.bf16.msra.mxu1 %v3996_v51  ;;  %v3567_v22 = vcombine.low %v262_v14, %v270_v15  ;;  %v3584_v25 = vcombine.high %v278_v20, %v286_v21  ;;  %v3583_v29 = vcombine.low %v278_v20, %v286_v21  ;;  %v3962_v51 = vld [vmem:[#allocation10 + $0x44] ss:$8 sps:$4 sm:$0xff]   ;;  %v3990_v15 = vld [vmem:[#allocation10 + $0xe0] ss:$8 sps:$4 sm:$0xff]  }
 0x18f   :  { %3060 = vmatprep.subr.bf16.mxu1 %v4004_v58  ;;  %v3968_v58 = vld [vmem:[#allocation10 + $0x64] ss:$8 sps:$4 sm:$0xff]  }
 0x190   :  { %v3992_v14 = vld [vmem:[#allocation10 + $0xe4] ss:$8 sps:$4 sm:$0xff]  }
 0x191   :  { %1235 = vmatpush1.bf16.msra.mxu0 %v3499_v26  ;;  %v4032_v26 = vld [vmem:[#allocation10 + $0x360] ss:$8 sps:$4 sm:$0xff]  }
 0x192   :  { %1236 = vmatprep.subr.bf16.mxu0 %v3516_v27  ;;  %3061 = vmatpush1.bf16.msra.mxu1 %v4002_v57  ;;  %v294_v27 = vld [vmem:[#allocation7 + $0x3b8] sm:$0xff] }
 0x193   :  { %3062 = vmatprep.subr.bf16.mxu1 %v4010_v0  ;;  %v3599_v33 = vcombine.low %v294_v27, %v302_v28  ;;  %v4082_v57 = vld [vmem:[#allocation10 + $0x3e4] ss:$8 sps:$4 sm:$0xff]   ;;  %v3969_v0 = vld [vmem:[#allocation10 + $0x70] ss:$8 sps:$4 sm:$0xff]  }
 0x195   :  { %1237 = vmatpush1.bf16.msra.mxu0 %v3515_v30  ;;  %v4040_v30 = vld [vmem:[#allocation10 + $0x374] ss:$8 sps:$4 sm:$0xff]  }
 0x196   :  { %1238 = vmatprep.subr.bf16.mxu0 %v3532_v31  ;;  %3063 = vmatpush1.bf16.msra.mxu1 %v4008_v63  ;;  %v3600_v31 = vcombine.high %v294_v27, %v302_v28  ;;  %v4086_v63 = vld [vmem:[#allocation10 + $0x3f0] ss:$8 sps:$4 sm:$0xff]  }
 0x197   :  { %3064 = vmatprep.subr.bf16.mxu1 %v4016_v6  ;;  %v3980_v6 = vld [vmem:[#allocation10 + $0xa4] ss:$8 sps:$4 sm:$0xff]  }
 0x199   :  { %1239 = vmatpush1.bf16.msra.mxu0 %v3531_v34  ;;  %v4046_v34 = vld [vmem:[#allocation10 + $0x384] ss:$8 sps:$4 sm:$0xff]  }
 0x19a   :  { %1240 = vmatprep.subr.bf16.mxu0 %v3548_v35  ;;  %3065 = vmatpush1.bf16.msra.mxu1 %v4014_v5  ;;  %v3950_v35 = vld [vmem:[#allocation10 + $0x4] ss:$8 sps:$4 sm:$0xff]   ;;  %v3975_v5 = vld [vmem:[#allocation10 + $0x90] ss:$8 sps:$4 sm:$0xff]  }
 0x19b   :  { %3066 = vmatprep.subr.bf16.mxu1 %v4022_v11  ;;  %v3989_v11 = vld [vmem:[#allocation10 + $0xd4] ss:$8 sps:$4 sm:$0xff]  }
 0x19d   :  { %1241 = vmatpush1.bf16.msra.mxu0 %v3547_v38  ;;  %v4050_v38 = vld [vmem:[#allocation10 + $0x390] ss:$8 sps:$4 sm:$0xff]  }
 0x19e   :  { %1242 = vmatprep.subr.bf16.mxu0 %v3564_v39  ;;  %3067 = vmatpush1.bf16.msra.mxu1 %v4020_v10  ;;  %v4052_v39 = vld [vmem:[#allocation10 + $0x394] ss:$8 sps:$4 sm:$0xff]   ;;  %v3984_v10 = vld [vmem:[#allocation10 + $0xc0] ss:$8 sps:$4 sm:$0xff]  }
 0x19f   :  { %3068 = vmatprep.subr.bf16.mxu1 %v4028_v18  ;;  %v4001_v18 = vld [vmem:[#allocation10 + $0x104] ss:$8 sps:$4 sm:$0xff]  }
 0x1a1   :  { %1243 = vmatpush1.bf16.msra.mxu0 %v3563_v42  ;;  %v4056_v42 = vld [vmem:[#allocation10 + $0x3a0] ss:$8 sps:$4 sm:$0xff]  }
 0x1a2   :  { %1244 = vmatprep.subr.bf16.mxu0 %v3580_v43  ;;  %3069 = vmatpush1.bf16.msra.mxu1 %v4026_v17  ;;  %v4058_v43 = vld [vmem:[#allocation10 + $0x3a4] ss:$8 sps:$4 sm:$0xff]   ;;  %v3993_v17 = vld [vmem:[#allocation10 + $0xf0] ss:$8 sps:$4 sm:$0xff]  }
 0x1a3   :  { %3070 = vmatprep.subr.bf16.mxu1 %v4034_v23 }
 0x1a5   :  { %1245 = vmatpush1.bf16.msra.mxu0 %v3579_v46  ;;  %v4062_v46 = vld [vmem:[#allocation10 + $0x3b0] ss:$8 sps:$4 sm:$0xff]  }
 0x1a6   :  { %1246 = vmatprep.subr.bf16.mxu0 %v3596_v47  ;;  %3071 = vmatpush1.bf16.msra.mxu1 %v4032_v26  ;;  %v4064_v47 = vld [vmem:[#allocation10 + $0x3b4] ss:$8 sps:$4 sm:$0xff]  }
 0x1a7   :  { %3072 = vmatprep.subr.bf16.mxu1 %v4040_v30 }
 0x1a9   :  { %1247 = vmatpush1.bf16.msra.mxu0 %v3595_v50  ;;  %v4070_v50 = vld [vmem:[#allocation10 + $0x3c4] ss:$8 sps:$4 sm:$0xff]  }
 0x1aa   :  { %1314 = vmatprep.subr.bf16.mxu0 %v3488_v53  ;;  %3073 = vmatpush1.bf16.msra.mxu1 %v4038_v32  ;;  %v4074_v53 = vld [vmem:[#allocation10 + $0x3d0] ss:$8 sps:$4 sm:$0xff]  }
 0x1ab   :  { %3074 = vmatprep.subr.bf16.mxu1 %v4046_v34 }
 0x1ac   :  { %1265 = vmatmul.mubr.bf16.vlgmr.msra.gmra.mrb[16].mxu0 %v4666_v24 }
 0x1ad   :  { %1315 = vmatpush1.bf16.msra.mxu0 %v3487_v56  ;;  %1346 = vmatprep.mubr.bf16.mxu0 %v4529_v12  ;;  %v3535_v12 = vcombine.low %v230_v2, %v238_v3  ;;  %v3963_v56 = vld [vmem:[#allocation10 + $0x50] ss:$8 sps:$4 sm:$0xff]   ;;  %v3974_v2 = vld [vmem:[#allocation10 + $0x84] ss:$8 sps:$4 sm:$0xff]   ;;  %v3972_v3 = vld [vmem:[#allocation10 + $0x80] ss:$8 sps:$4 sm:$0xff]  }
 0x1ae   :  { %1316 = vmatprep.subr.bf16.mxu0 %v3504_v59  ;;  %3075 = vmatpush1.bf16.msra.mxu1 %v4044_v36  ;;  %v4080_v59 = vld [vmem:[#allocation10 + $0x3e0] ss:$8 sps:$4 sm:$0xff]  }
 0x1af   :  { %3076 = vmatprep.subr.bf16.mxu1 %v4052_v39 }
 0x1b1   :  { %1317 = vmatpush1.bf16.msra.mxu0 %v3503_v62  ;;  %v3971_v62 = vld [vmem:[#allocation10 + $0x74] ss:$8 sps:$4 sm:$0xff]  }
 0x1b2   :  { %1318 = vmatprep.subr.bf16.mxu0 %v3520_v1  ;;  %3077 = vmatpush1.bf16.msra.mxu1 %v4050_v38  ;;  %v4094_v1 = vld [vmem:[#allocation10 + $0x404] ss:$8 sps:$4 sm:$0xff]  }
 0x1b3   :  { %3078 = vmatprep.subr.bf16.mxu1 %v4058_v43  ;;  %v4005_v43 = vld [vmem:[#allocation10 + $0x110] ss:$8 sps:$4 sm:$0xff]  }
 0x1b5   :  { %1319 = vmatpush1.bf16.msra.mxu0 %v3519_v4  ;;  %v3977_v4 = vld [vmem:[#allocation10 + $0x94] ss:$8 sps:$4 sm:$0xff]  }
 0x1b6   :  { %1320 = vmatprep.subr.bf16.mxu0 %v3536_v7  ;;  %3079 = vmatpush1.bf16.msra.mxu1 %v4056_v42  ;;  %v3978_v7 = vld [vmem:[#allocation10 + $0xa0] ss:$8 sps:$4 sm:$0xff]   ;;  %v4007_v42 = vld [vmem:[#allocation10 + $0x114] ss:$8 sps:$4 sm:$0xff]  }
 0x1b7   :  { %3080 = vmatprep.subr.bf16.mxu1 %v4064_v47  ;;  %v4017_v47 = vld [vmem:[#allocation10 + $0x130] ss:$8 sps:$4 sm:$0xff]  }
 0x1b9   :  { %1321 = vmatpush1.bf16.msra.mxu0 %v3535_v12  ;;  %v3986_v12 = vld [vmem:[#allocation10 + $0xc4] ss:$8 sps:$4 sm:$0xff]  }
 0x1ba   :  { %1322 = vmatprep.subr.bf16.mxu0 %v3552_v13  ;;  %3081 = vmatpush1.bf16.msra.mxu1 %v4062_v46  ;;  %v3987_v13 = vld [vmem:[#allocation10 + $0xd0] ss:$8 sps:$4 sm:$0xff]   ;;  %v4019_v46 = vld [vmem:[#allocation10 + $0x134] ss:$8 sps:$4 sm:$0xff]  }
 0x1bb   :  { %3082 = vmatprep.subr.bf16.mxu1 %v4070_v50  ;;  %v4029_v50 = vld [vmem:[#allocation10 + $0x150] ss:$8 sps:$4 sm:$0xff]  }
 0x1bd   :  { %1323 = vmatpush1.bf16.msra.mxu0 %v3551_v16  ;;  %v3995_v16 = vld [vmem:[#allocation10 + $0xf4] ss:$8 sps:$4 sm:$0xff]  }
 0x1be   :  { %1324 = vmatprep.subr.bf16.mxu0 %v3568_v19  ;;  %v307_v19 = vlaneseq }
 0x1c0   :  { %v4682_v20 = vshrl.u32 %v307_v19, 7  ;;  %v4077_v19 = vld [vmem:[#allocation10 + $0x1d0] ss:$8 sps:$4 sm:$0xff]  }
 0x1c1   :  { %1325 = vmatpush1.bf16.msra.mxu0 %v3567_v22  ;;  %v4687_v22 = vld [vmem:[#allocation8] sm:$0xff] }
 0x1c2   :  { %1326 = vmatprep.subr.bf16.mxu0 %v3584_v25  ;;  %v4685_v21 = vsub.s32 0, %v4682_v20  ;;  %v4690_v23 = vsub.s32 1, %v4682_v20 }
 0x1c4   :  { %v310_v25 = vrot.slane %v4687_v22, %v4685_v21  ;;  %v314_v26 = vrot.slane %v4687_v22, %v4690_v23 }
 0x1c5   :  { %1327 = vmatpush1.bf16.msra.mxu0 %v3583_v29 }
 0x1c6   :  { %1328 = vmatprep.subr.bf16.mxu0 %v3600_v31 }
 0x1c9   :  { %1329 = vmatpush1.bf16.msra.mxu0 %v3599_v33 }
 0x1ca   :  { %2935 = vmatprep.subr.bf16.mxu0 %v3950_v35 }
 0x1cc   :  { %1347 = vmatmul.mubr.bf16.vlgmr.msra.gmra.mrb[20].mxu0 %v4666_v24  ;;  %v4068_v24 = vld [vmem:[#allocation10 + $0x3c0] ss:$8 sps:$4 sm:$0xff]  }
 0x1cd   :  { %2936 = vmatpush1.bf16.msra.mxu0 %v3948_v37  ;;  %3083 = vmatpush1.bf16.msra.mxu1 %v4068_v24  ;;  %v4031_v24 = vld [vmem:[#allocation10 + $0x154] ss:$8 sps:$4 sm:$0xff]  }
 0x1ce   :  { %2937 = vmatprep.subr.bf16.mxu0 %v3953_v40  ;;  %3084 = vmatprep.subr.bf16.mxu1 %v4076_v54  ;;  %v3999_v40 = vld [vmem:[#allocation10 + $0x100] ss:$8 sps:$4 sm:$0xff]  }
 0x1cf   :  { %v4035_v54 = vld [vmem:[#allocation10 + $0x160] ss:$8 sps:$4 sm:$0xff]  }
 0x1d1   :  { %2938 = vmatpush1.bf16.msra.mxu0 %v3951_v41  ;;  %3085 = vmatpush1.bf16.msra.mxu1 %v4074_v53 }
 0x1d2   :  { %2939 = vmatprep.subr.bf16.mxu0 %v3956_v44  ;;  %3086 = vmatprep.subr.bf16.mxu1 %v4082_v57  ;;  %v4013_v44 = vld [vmem:[#allocation10 + $0x124] ss:$8 sps:$4 sm:$0xff]  }
 0x1d5   :  { %2940 = vmatpush1.bf16.msra.mxu0 %v3954_v45  ;;  %3087 = vmatpush1.bf16.msra.mxu1 %v4080_v59  ;;  %v4011_v45 = vld [vmem:[#allocation10 + $0x120] ss:$8 sps:$4 sm:$0xff]  }
 0x1d6   :  { %2941 = vmatprep.subr.bf16.mxu0 %v3959_v48  ;;  %3088 = vmatprep.subr.bf16.mxu1 %v4088_v61  ;;  %v4025_v48 = vld [vmem:[#allocation10 + $0x144] ss:$8 sps:$4 sm:$0xff]  }
 0x1d9   :  { %2942 = vmatpush1.bf16.msra.mxu0 %v3957_v49  ;;  %3089 = vmatpush1.bf16.msra.mxu1 %v4086_v63  ;;  %v4023_v49 = vld [vmem:[#allocation10 + $0x140] ss:$8 sps:$4 sm:$0xff]   ;;  %v4041_v63 = vld [vmem:[#allocation10 + $0x170] ss:$8 sps:$4 sm:$0xff]  }
 0x1da   :  { %2943 = vmatprep.subr.bf16.mxu0 %v3962_v51  ;;  %3099 = vmatprep.subr.bf16.mxu1 %v4094_v1  ;;  %v321_v51 = vsub.s32 3, %v4682_v20 }
 0x1dc   :  { %v322_v53 = vrot.slane %v4687_v22, %v321_v51 }
 0x1dd   :  { %2944 = vmatpush1.bf16.msra.mxu0 %v3960_v52  ;;  %v4037_v52 = vld [vmem:[#allocation10 + $0x164] ss:$8 sps:$4 sm:$0xff]  }
 0x1de   :  { %2945 = vmatprep.subr.bf16.mxu0 %v3965_v55  ;;  %v4043_v55 = vld [vmem:[#allocation10 + $0x174] ss:$8 sps:$4 sm:$0xff]  }
 0x1e1   :  { %2946 = vmatpush1.bf16.msra.mxu0 %v3963_v56 }
 0x1e2   :  { %2947 = vmatprep.subr.bf16.mxu0 %v3968_v58 }
 0x1e5   :  { %2948 = vmatpush1.bf16.msra.mxu0 %v3966_v60 }
 0x1e6   :  { %2949 = vmatprep.subr.bf16.mxu0 %v3971_v62 }
 0x1e9   :  { %2950 = vmatpush1.bf16.msra.mxu0 %v3969_v0 }
 0x1ea   :  { %2951 = vmatprep.subr.bf16.mxu0 %v3974_v2  ;;  %v4049_v2 = vld [vmem:[#allocation10 + $0x184] ss:$8 sps:$4 sm:$0xff]  }
 0x1ed   :  { %2952 = vmatpush1.bf16.msra.mxu0 %v3972_v3 }
 0x1ee   :  { %2953 = vmatprep.subr.bf16.mxu0 %v3977_v4 }
 0x1f1   :  { %2954 = vmatpush1.bf16.msra.mxu0 %v3975_v5  ;;  %v4047_v5 = vld [vmem:[#allocation10 + $0x180] ss:$8 sps:$4 sm:$0xff]  }
 0x1f2   :  { %2955 = vmatprep.subr.bf16.mxu0 %v3980_v6  ;;  %v4055_v6 = vld [vmem:[#allocation10 + $0x194] ss:$8 sps:$4 sm:$0xff]  }
 0x1f5   :  { %2956 = vmatpush1.bf16.msra.mxu0 %v3978_v7  ;;  %v4053_v7 = vld [vmem:[#allocation10 + $0x190] ss:$8 sps:$4 sm:$0xff]  }
 0x1f6   :  { %2957 = vmatprep.subr.bf16.mxu0 %v3983_v8  ;;  %v4061_v8 = vld [vmem:[#allocation10 + $0x1a4] ss:$8 sps:$4 sm:$0xff]  }
 0x1f9   :  { %2958 = vmatpush1.bf16.msra.mxu0 %v3981_v9  ;;  %v4059_v9 = vld [vmem:[#allocation10 + $0x1a0] ss:$8 sps:$4 sm:$0xff]  }
 0x1fa   :  { %2959 = vmatprep.subr.bf16.mxu0 %v3986_v12  ;;  %v4067_v12 = vld [vmem:[#allocation10 + $0x1b4] ss:$8 sps:$4 sm:$0xff]  }
 0x1fd   :  { %2960 = vmatpush1.bf16.msra.mxu0 %v3984_v10  ;;  %v4065_v10 = vld [vmem:[#allocation10 + $0x1b0] ss:$8 sps:$4 sm:$0xff]  }
 0x1fe   :  { %2961 = vmatprep.subr.bf16.mxu0 %v3989_v11  ;;  %v4073_v11 = vld [vmem:[#allocation10 + $0x1c4] ss:$8 sps:$4 sm:$0xff]  }
 0x201   :  { %2962 = vmatpush1.bf16.msra.mxu0 %v3987_v13  ;;  %v4071_v13 = vld [vmem:[#allocation10 + $0x1c0] ss:$8 sps:$4 sm:$0xff]  }
 0x202   :  { %2963 = vmatprep.subr.bf16.mxu0 %v3992_v14  ;;  %v317_v14 = vsub.s32 2, %v4682_v20 }
 0x205   :  { %2964 = vmatpush1.bf16.msra.mxu0 %v3990_v15  ;;  %v4079_v15 = vld [vmem:[#allocation10 + $0x1d4] ss:$8 sps:$4 sm:$0xff]  }
 0x206   :  { %2965 = vmatprep.subr.bf16.mxu0 %v3995_v16  ;;  %v329_v16 = vsub.s32 5, %v4682_v20 }
 0x209   :  { %2966 = vmatpush1.bf16.msra.mxu0 %v3993_v17  ;;  %v333_v17 = vsub.s32 6, %v4682_v20 }
 0x20a   :  { %2976 = vmatprep.subr.bf16.mxu0 %v4001_v18  ;;  %v4709_v18 = vld [vmem:[#allocation8 + $0x8] sm:$0xff] }
 0x21f   :  { %v1061_v27 = vpop.f32.mrb[4].mxu0  ;;  %v4696_v28 = vpop.f32.mrb[0].mxu1 }
 0x220   :  { %v1062_v29 = vadd.f32 %v1061_v27, %v310_v25  ;;  %v1063_v30 = vpop.f32.mrb[5].mxu0  ;;  %v4698_v31 = vpop.f32.mrb[1].mxu1  ;;  %v337_v25 = vsub.s32 7, %v4682_v20  ;;  %v318_v27 = vrot.slane %v4687_v22, %v317_v14 }
 0x221   :  { %v1064_v32 = vadd.f32 %v1063_v30, %v314_v26  ;;  %v1065_v33 = vpop.f32.mrb[6].mxu0  ;;  %v1147_v34 = vpop.f32.mrb[2].mxu1  ;;  %v325_v26 = vsub.s32 4, %v4682_v20  ;;  %v330_v30 = vrot.slane %v4687_v22, %v329_v16  ;;  %v4289_v20 = vld [vmem:[#allocation10 + $0x714] ss:$8 sps:$4 sm:$0xff]  }
 0x222   :  { %v1355_v35 = vmax.f32 %v1062_v29, 0.0  ;;  %v1066_v36 = vpop.f32.mrb[7].mxu0  ;;  %v1148_v37 = vpop.f32.mrb[3].mxu1  ;;  %v4085_v29 = vld [vmem:[#allocation10 + $0x1e4] ss:$8 sps:$4 sm:$0xff]   ;;  %v334_v33 = vrot.slane %v4687_v22, %v333_v17 }
 0x223   :  { %v1356_v38 = vmax.f32 %v1064_v32, 0.0  ;;  %v346_v32 = vrot.slane %v4709_v18, %v4690_v23  ;;  %v358_v34 = vrot.slane %v4709_v18, %v325_v26  ;;  %v362_v36 = vrot.slane %v4709_v18, %v329_v16  ;;  %v4083_v37 = vld [vmem:[#allocation10 + $0x1e0] ss:$8 sps:$4 sm:$0xff]   ;;  %v4113_v16 = vld [vmem:[#allocation10 + $0x230] ss:$8 sps:$4 sm:$0xff]  }
 0x224   :  { %v1371_v41 = vpack.c.bf16 %v1355_v35, %v1355_v35  ;;  %v338_v35 = vrot.slane %v4687_v22, %v337_v25 }
 0x225   :  { %v1372_v39 = vpack.c.bf16 %v1356_v38, %v1356_v38 }
 0x227   :  { %2967 = vmatprep.mubr.bf16.mxu0 %v1372_v39  ;;  %v4091_v39 = vld [vmem:[#allocation10 + $0x1f4] ss:$8 sps:$4 sm:$0xff]  }
 0x228   :  { %2968 = vmatmul.mubr.bf16.vlgmr.msra.gmra.mrb[24].mxu0 %v1371_v41 }
 0x229   :  { %2977 = vmatpush1.bf16.msra.mxu0 %v3999_v40 }
 0x22a   :  { %2978 = vmatprep.subr.bf16.mxu0 %v4007_v42  ;;  %v1146_v42 = vadd.f32 %v4698_v31, %v330_v30  ;;  %v4119_v30 = vld [vmem:[#allocation10 + $0x240] ss:$8 sps:$4 sm:$0xff]  }
 0x22d   :  { %2979 = vmatpush1.bf16.msra.mxu0 %v4005_v43 }
 0x22e   :  { %2980 = vmatprep.subr.bf16.mxu0 %v4013_v44 }
 0x231   :  { %2981 = vmatpush1.bf16.msra.mxu0 %v4011_v45 }
 0x232   :  { %2982 = vmatprep.subr.bf16.mxu0 %v4019_v46 }
 0x235   :  { %2983 = vmatpush1.bf16.msra.mxu0 %v4017_v47 }
 0x236   :  { %2984 = vmatprep.subr.bf16.mxu0 %v4025_v48 }
 0x239   :  { %2985 = vmatpush1.bf16.msra.mxu0 %v4023_v49 }
 0x23a   :  { %2986 = vmatprep.subr.bf16.mxu0 %v4031_v24 }
 0x23d   :  { %2987 = vmatpush1.bf16.msra.mxu0 %v4029_v50 }
 0x23e   :  { %2988 = vmatprep.subr.bf16.mxu0 %v4037_v52  ;;  %v4089_v52 = vld [vmem:[#allocation10 + $0x1f0] ss:$8 sps:$4 sm:$0xff]  }
 0x23f   :  { %v1102_v56 = vpop.f32.mrb[8].mxu0  ;;  %v4704_v57 = vpop.f32.mrb[4].mxu1 }
 0x240   :  { %v1104_v58 = vpop.f32.mrb[9].mxu0  ;;  %v1227_v59 = vpop.f32.mrb[5].mxu1  ;;  %v1103_v38 = vadd.f32 %v1102_v56, %v318_v27  ;;  %v4121_v27 = vld [vmem:[#allocation10 + $0x244] ss:$8 sps:$4 sm:$0xff]  }
 0x241   :  { %v1105_v60 = vadd.f32 %v1104_v58, %v322_v53  ;;  %v1106_v61 = vpop.f32.mrb[10].mxu0  ;;  %v1229_v62 = vpop.f32.mrb[6].mxu1  ;;  %2989 = vmatpush1.bf16.msra.mxu0 %v4035_v54  ;;  %v1228_v43 = vadd.f32 %v1227_v59, %v346_v32  ;;  %v4097_v58 = vld [vmem:[#allocation10 + $0x204] ss:$8 sps:$4 sm:$0xff]   ;;  %v1360_v59 = vmax.f32 %v1146_v42, 0.0 }
 0x242   :  { %v1107_v0 = vpop.f32.mrb[11].mxu0  ;;  %v1230_v1 = vpop.f32.mrb[7].mxu1  ;;  %2990 = vmatprep.subr.bf16.mxu0 %v4043_v55  ;;  %v1357_v53 = vmax.f32 %v1103_v38, 0.0  ;;  %v4092_v62 = vld [vmem:[#allocation10 + $0x400] ss:$8 sps:$4 sm:$0xff]   ;;  %v350_v38 = vrot.slane %v4709_v18, %v317_v14 }
 0x243   :  { %v1358_v3 = vmax.f32 %v1105_v60, 0.0  ;;  %v1364_v60 = vmax.f32 %v1228_v43, 0.0  ;;  %v4124_v32 = vld [vmem:[#allocation10 + $0x454] ss:$8 sps:$4 sm:$0xff]   ;;  %v4142_v14 = vld [vmem:[#allocation10 + $0x484] ss:$8 sps:$4 sm:$0xff]  }
 0x244   :  { %v1373_v0 = vpack.c.bf16 %v1357_v53, %v1357_v53  ;;  %v4139_v42 = vld [vmem:[#allocation10 + $0x274] ss:$8 sps:$4 sm:$0xff]   ;;  %v4140_v53 = vld [vmem:[#allocation10 + $0x480] ss:$8 sps:$4 sm:$0xff]  }
 0x245   :  { %v1374_v4 = vpack.c.bf16 %v1358_v3, %v1358_v3  ;;  %2991 = vmatpush1.bf16.msra.mxu0 %v4041_v63  ;;  %v4095_v63 = vld [vmem:[#allocation10 + $0x200] ss:$8 sps:$4 sm:$0xff]   ;;  %v4103_v3 = vld [vmem:[#allocation10 + $0x214] ss:$8 sps:$4 sm:$0xff]  }
 0x246   :  { %2992 = vmatprep.subr.bf16.mxu0 %v4049_v2  ;;  %v4100_v2 = vld [vmem:[#allocation10 + $0x414] ss:$8 sps:$4 sm:$0xff]  }
 0x247   :  { %3008 = vmatprep.mubr.bf16.mxu0 %v1374_v4  ;;  %v1376_v4 = vpack.c.bf16 %v1360_v59, %v1360_v59  ;;  %v4154_v59 = vld [vmem:[#allocation10 + $0x4a4] ss:$8 sps:$4 sm:$0xff]  }
 0x249   :  { %2993 = vmatpush1.bf16.msra.mxu0 %v4047_v5  ;;  %v1380_v5 = vpack.c.bf16 %v1364_v60, %v1364_v60  ;;  %v4157_v60 = vld [vmem:[#allocation10 + $0x2a4] ss:$8 sps:$4 sm:$0xff]  }
 0x24a   :  { %2994 = vmatprep.subr.bf16.mxu0 %v4055_v6  ;;  %v4098_v6 = vld [vmem:[#allocation10 + $0x410] ss:$8 sps:$4 sm:$0xff]  }
 0x24d   :  { %2995 = vmatpush1.bf16.msra.mxu0 %v4053_v7  ;;  %v4101_v7 = vld [vmem:[#allocation10 + $0x210] ss:$8 sps:$4 sm:$0xff]  }
 0x24e   :  { %2996 = vmatprep.subr.bf16.mxu0 %v4061_v8  ;;  %v4106_v8 = vld [vmem:[#allocation10 + $0x424] ss:$8 sps:$4 sm:$0xff]  }
 0x251   :  { %2997 = vmatpush1.bf16.msra.mxu0 %v4059_v9  ;;  %v4109_v9 = vld [vmem:[#allocation10 + $0x224] ss:$8 sps:$4 sm:$0xff]  }
 0x252   :  { %2998 = vmatprep.subr.bf16.mxu0 %v4067_v12  ;;  %v4104_v12 = vld [vmem:[#allocation10 + $0x420] ss:$8 sps:$4 sm:$0xff]  }
 0x255   :  { %2999 = vmatpush1.bf16.msra.mxu0 %v4065_v10  ;;  %v4107_v10 = vld [vmem:[#allocation10 + $0x220] ss:$8 sps:$4 sm:$0xff]  }
 0x256   :  { %3000 = vmatprep.subr.bf16.mxu0 %v4073_v11  ;;  %v4112_v11 = vld [vmem:[#allocation10 + $0x434] ss:$8 sps:$4 sm:$0xff]  }
 0x259   :  { %3001 = vmatpush1.bf16.msra.mxu0 %v4071_v13  ;;  %v4115_v13 = vld [vmem:[#allocation10 + $0x234] ss:$8 sps:$4 sm:$0xff]  }
 0x25a   :  { %3002 = vmatprep.subr.bf16.mxu0 %v4079_v15  ;;  %v4110_v15 = vld [vmem:[#allocation10 + $0x430] ss:$8 sps:$4 sm:$0xff]  }
 0x25d   :  { %3003 = vmatpush1.bf16.msra.mxu0 %v4077_v19  ;;  %v4118_v19 = vld [vmem:[#allocation10 + $0x444] ss:$8 sps:$4 sm:$0xff]  }
 0x25e   :  { %3004 = vmatprep.subr.bf16.mxu0 %v4085_v29  ;;  %v4116_v29 = vld [vmem:[#allocation10 + $0x440] ss:$8 sps:$4 sm:$0xff]  }
 0x25f   :  { %v1184_v40 = vpop.f32.mrb[12].mxu0  ;;  %v1307_v41 = vpop.f32.mrb[8].mxu1 }
 0x260   :  { %v1185_v44 = vadd.f32 %v1184_v40, %v334_v33  ;;  %v4730_v45 = vadd.f32 %v1307_v41, %v358_v34  ;;  %v1186_v46 = vpop.f32.mrb[13].mxu0  ;;  %v1309_v47 = vpop.f32.mrb[9].mxu1  ;;  %v4127_v33 = vld [vmem:[#allocation10 + $0x254] ss:$8 sps:$4 sm:$0xff]   ;;  %v4122_v34 = vld [vmem:[#allocation10 + $0x450] ss:$8 sps:$4 sm:$0xff]  }
 0x261   :  { %v1187_v48 = vadd.f32 %v1186_v46, %v338_v35  ;;  %v4732_v49 = vadd.f32 %v1309_v47, %v362_v36  ;;  %v1188_v24 = vpop.f32.mrb[14].mxu0  ;;  %v1311_v50 = vpop.f32.mrb[10].mxu1  ;;  %3005 = vmatpush1.bf16.msra.mxu0 %v4083_v37  ;;  %v4125_v35 = vld [vmem:[#allocation10 + $0x250] ss:$8 sps:$4 sm:$0xff]   ;;  %v4130_v36 = vld [vmem:[#allocation10 + $0x464] ss:$8 sps:$4 sm:$0xff]  }
 0x262   :  { %v1361_v54 = vmax.f32 %v1185_v44, 0.0  ;;  %v1189_v55 = vpop.f32.mrb[15].mxu0  ;;  %v1312_v56 = vpop.f32.mrb[11].mxu1  ;;  %3006 = vmatprep.subr.bf16.mxu0 %v4091_v39  ;;  %v4133_v37 = vld [vmem:[#allocation10 + $0x264] ss:$8 sps:$4 sm:$0xff]  }
 0x263   :  { %v1362_v31 = vmax.f32 %v1187_v48, 0.0  ;;  %v4128_v39 = vld [vmem:[#allocation10 + $0x460] ss:$8 sps:$4 sm:$0xff]   ;;  %v4136_v41 = vld [vmem:[#allocation10 + $0x474] ss:$8 sps:$4 sm:$0xff]  }
 0x264   :  { %v1377_v1 = vpack.c.bf16 %v1361_v54, %v1361_v54  ;;  %v4131_v40 = vld [vmem:[#allocation10 + $0x260] ss:$8 sps:$4 sm:$0xff]   ;;  %v4134_v48 = vld [vmem:[#allocation10 + $0x470] ss:$8 sps:$4 sm:$0xff]   ;;  %v4148_v55 = vld [vmem:[#allocation10 + $0x494] ss:$8 sps:$4 sm:$0xff]  }
 0x265   :  { %v1378_v61 = vpack.c.bf16 %v1362_v31, %v1362_v31  ;;  %3007 = vmatpush1.bf16.msra.mxu0 %v4089_v52  ;;  %v4137_v24 = vld [vmem:[#allocation10 + $0x270] ss:$8 sps:$4 sm:$0xff]   ;;  %v4145_v52 = vld [vmem:[#allocation10 + $0x284] ss:$8 sps:$4 sm:$0xff]   ;;  %v4143_v54 = vld [vmem:[#allocation10 + $0x280] ss:$8 sps:$4 sm:$0xff]  }
 0x266   :  { %3017 = vmatprep.subr.bf16.mxu0 %v4097_v58  ;;  %v4151_v56 = vld [vmem:[#allocation10 + $0x294] ss:$8 sps:$4 sm:$0xff]   ;;  %v4146_v58 = vld [vmem:[#allocation10 + $0x490] ss:$8 sps:$4 sm:$0xff]  }
 0x267   :  { %3090 = vmatprep.mubr.bf16.mxu1 %v1378_v61  ;;  %v4149_v31 = vld [vmem:[#allocation10 + $0x290] ss:$8 sps:$4 sm:$0xff]   ;;  %v4152_v61 = vld [vmem:[#allocation10 + $0x4a0] ss:$8 sps:$4 sm:$0xff]  }
 0x268   :  { %3009 = vmatmul.mubr.bf16.vlgmr.msra.gmra.mrb[24].mxu0 %v1373_v0  ;;  %3091 = vmatmul.mubr.bf16.vlgmr.msra.gmra.mrb[12].mxu1 %v1377_v1  ;;  %v4163_v0 = vld [vmem:[#allocation10 + $0x2b4] ss:$8 sps:$4 sm:$0xff]   ;;  %v4158_v1 = vld [vmem:[#allocation10 + $0x4b0] ss:$8 sps:$4 sm:$0xff]  }
 0x269   :  { %3100 = vmatpush1.bf16.msra.mxu1 %v4092_v62  ;;  %3018 = vmatpush1.bf16.msra.mxu0 %v4095_v63  ;;  %v4155_v62 = vld [vmem:[#allocation10 + $0x2a0] ss:$8 sps:$4 sm:$0xff]   ;;  %v4160_v63 = vld [vmem:[#allocation10 + $0x4b4] ss:$8 sps:$4 sm:$0xff]  }
 0x26a   :  { %3049 = vmatprep.mubr.bf16.mxu0 %v1376_v4  ;;  %3131 = vmatprep.mubr.bf16.mxu1 %v1380_v5  ;;  %v4169_v4 = vld [vmem:[#allocation10 + $0x2c4] ss:$8 sps:$4 sm:$0xff]   ;;  %v4164_v5 = vld [vmem:[#allocation10 + $0x4c0] ss:$8 sps:$4 sm:$0xff]  }
 0x26b   :  { %3101 = vmatprep.subr.bf16.mxu1 %v4100_v2  ;;  %3019 = vmatprep.subr.bf16.mxu0 %v4103_v3  ;;  %v4161_v2 = vld [vmem:[#allocation10 + $0x2b0] ss:$8 sps:$4 sm:$0xff]   ;;  %v4166_v3 = vld [vmem:[#allocation10 + $0x4c4] ss:$8 sps:$4 sm:$0xff]  }
 0x26d   :  { %3102 = vmatpush1.bf16.msra.mxu1 %v4098_v6  ;;  %3020 = vmatpush1.bf16.msra.mxu0 %v4101_v7  ;;  %v4167_v6 = vld [vmem:[#allocation10 + $0x2c0] ss:$8 sps:$4 sm:$0xff]   ;;  %v4172_v7 = vld [vmem:[#allocation10 + $0x4d4] ss:$8 sps:$4 sm:$0xff]  }
 0x26e   :  { %3103 = vmatprep.subr.bf16.mxu1 %v4106_v8  ;;  %3021 = vmatprep.subr.bf16.mxu0 %v4109_v9  ;;  %v4175_v8 = vld [vmem:[#allocation10 + $0x2d4] ss:$8 sps:$4 sm:$0xff]   ;;  %v4170_v9 = vld [vmem:[#allocation10 + $0x4d0] ss:$8 sps:$4 sm:$0xff]  }
 0x271   :  { %3104 = vmatpush1.bf16.msra.mxu1 %v4104_v12  ;;  %3022 = vmatpush1.bf16.msra.mxu0 %v4107_v10  ;;  %v4173_v12 = vld [vmem:[#allocation10 + $0x2d0] ss:$8 sps:$4 sm:$0xff]   ;;  %v326_v10 = vrot.slane %v4687_v22, %v325_v26 }
 0x272   :  { %3105 = vmatprep.subr.bf16.mxu1 %v4112_v11  ;;  %3023 = vmatprep.subr.bf16.mxu0 %v4115_v13  ;;  %v342_v11 = vrot.slane %v4709_v18, %v4685_v21  ;;  %v4178_v13 = vld [vmem:[#allocation10 + $0x4e4] ss:$8 sps:$4 sm:$0xff]  }
 0x273   :  { %v1144_v22 = vadd.f32 %v4696_v28, %v326_v10  ;;  %v4235_v10 = vld [vmem:[#allocation10 + $0x5f4] ss:$8 sps:$4 sm:$0xff]  }
 0x274   :  { %v1226_v26 = vadd.f32 %v4704_v57, %v342_v11  ;;  %v4190_v57 = vld [vmem:[#allocation10 + $0x504] ss:$8 sps:$4 sm:$0xff]   ;;  %v4233_v11 = vld [vmem:[#allocation10 + $0x5f0] ss:$8 sps:$4 sm:$0xff]  }
 0x275   :  { %3106 = vmatpush1.bf16.msra.mxu1 %v4110_v15  ;;  %3024 = vmatpush1.bf16.msra.mxu0 %v4113_v16  ;;  %v4181_v15 = vld [vmem:[#allocation10 + $0x2e4] ss:$8 sps:$4 sm:$0xff]   ;;  %v354_v16 = vrot.slane %v4709_v18, %v321_v51 }
 0x276   :  { %3107 = vmatprep.subr.bf16.mxu1 %v4118_v19  ;;  %3025 = vmatprep.subr.bf16.mxu0 %v4121_v27  ;;  %v366_v19 = vrot.slane %v4709_v18, %v333_v17  ;;  %v4176_v27 = vld [vmem:[#allocation10 + $0x4e0] ss:$8 sps:$4 sm:$0xff]   ;;  %v1363_v28 = vmax.f32 %v1226_v26, 0.0  ;;  %v4239_v26 = vld [vmem:[#allocation10 + $0x610] ss:$8 sps:$4 sm:$0xff]  }
 0x279   :  { %3108 = vmatpush1.bf16.msra.mxu1 %v4116_v29  ;;  %3026 = vmatpush1.bf16.msra.mxu0 %v4119_v30  ;;  %v4179_v29 = vld [vmem:[#allocation10 + $0x2e0] ss:$8 sps:$4 sm:$0xff]   ;;  %v4184_v30 = vld [vmem:[#allocation10 + $0x4f4] ss:$8 sps:$4 sm:$0xff]  }
 0x27a   :  { %3109 = vmatprep.subr.bf16.mxu1 %v4124_v32  ;;  %3027 = vmatprep.subr.bf16.mxu0 %v4127_v33  ;;  %v4187_v32 = vld [vmem:[#allocation10 + $0x2f4] ss:$8 sps:$4 sm:$0xff]  }
 0x27d   :  { %3110 = vmatpush1.bf16.msra.mxu1 %v4122_v34  ;;  %3028 = vmatpush1.bf16.msra.mxu0 %v4125_v35 }
 0x27e   :  { %3111 = vmatprep.subr.bf16.mxu1 %v4130_v36  ;;  %3029 = vmatprep.subr.bf16.mxu0 %v4133_v37  ;;  %v4182_v36 = vld [vmem:[#allocation10 + $0x4f0] ss:$8 sps:$4 sm:$0xff]  }
 0x27f   :  { %v1266_v43 = vpop.f32.mrb[16].mxu0  ;;  %v4185_v37 = vld [vmem:[#allocation10 + $0x2f0] ss:$8 sps:$4 sm:$0xff]  }
 0x280   :  { %v4737_v44 = vadd.f32 %v1266_v43, %v350_v38  ;;  %v4739_v46 = vpop.f32.mrb[17].mxu0  ;;  %v1359_v38 = vmax.f32 %v1144_v22, 0.0  ;;  %v1379_v43 = vpack.c.bf16 %v1363_v28, %v1363_v28  ;;  %v4259_v28 = vld [vmem:[#allocation10 + $0x674] ss:$8 sps:$4 sm:$0xff]  }
 0x281   :  { %3112 = vmatpush1.bf16.msra.mxu1 %v4128_v39  ;;  %v1270_v47 = vpop.f32.mrb[18].mxu0  ;;  %3030 = vmatpush1.bf16.msra.mxu0 %v4131_v40  ;;  %v1269_v33 = vadd.f32 %v4739_v46, %v354_v16  ;;  %v4193_v46 = vld [vmem:[#allocation10 + $0x514] ss:$8 sps:$4 sm:$0xff]   ;;  %v1368_v16 = vmax.f32 %v4732_v49, 0.0  ;;  %v4250_v49 = vld [vmem:[#allocation10 + $0x644] ss:$8 sps:$4 sm:$0xff]  }
 0x282   :  { %v1271_v50 = vpop.f32.mrb[19].mxu0  ;;  %3113 = vmatprep.subr.bf16.mxu1 %v4136_v41  ;;  %3031 = vmatprep.subr.bf16.mxu0 %v4139_v42  ;;  %v4188_v41 = vld [vmem:[#allocation10 + $0x500] ss:$8 sps:$4 sm:$0xff]   ;;  %v1375_v42 = vpack.c.bf16 %v1359_v38, %v1359_v38 }
 0x283   :  { %v1366_v40 = vmax.f32 %v1269_v33, 0.0  ;;  %v4194_v50 = vld [vmem:[#allocation10 + $0x520] ss:$8 sps:$4 sm:$0xff]   ;;  %v1384_v22 = vpack.c.bf16 %v1368_v16, %v1368_v16  ;;  %v4245_v33 = vld [vmem:[#allocation10 + $0x630] ss:$8 sps:$4 sm:$0xff]  }
 0x284   :  { %v4254_v38 = vld [vmem:[#allocation10 + $0x660] ss:$8 sps:$4 sm:$0xff]  }
 0x285   :  { %3114 = vmatpush1.bf16.msra.mxu1 %v4134_v48  ;;  %3032 = vmatpush1.bf16.msra.mxu0 %v4137_v24  ;;  %v1382_v47 = vpack.c.bf16 %v1366_v40, %v1366_v40  ;;  %v4191_v48 = vld [vmem:[#allocation10 + $0x510] ss:$8 sps:$4 sm:$0xff]   ;;  %v4196_v24 = vld [vmem:[#allocation10 + $0x524] ss:$8 sps:$4 sm:$0xff]   ;;  %v4296_v16 = vld [vmem:[#allocation10 + $0x740] ss:$8 sps:$4 sm:$0xff]  }
 0x286   :  { %3115 = vmatprep.subr.bf16.mxu1 %v4142_v14  ;;  %3033 = vmatprep.subr.bf16.mxu0 %v4145_v52  ;;  %v4199_v14 = vld [vmem:[#allocation10 + $0x534] ss:$8 sps:$4 sm:$0xff]   ;;  %v4197_v52 = vld [vmem:[#allocation10 + $0x530] ss:$8 sps:$4 sm:$0xff]   ;;  %v4334_v40 = vld [vmem:[#allocation11 + $0x48] sm:$0xff]  }
 0x289   :  { %3116 = vmatpush1.bf16.msra.mxu1 %v4140_v53  ;;  %3034 = vmatpush1.bf16.msra.mxu0 %v4143_v54  ;;  %v4202_v53 = vld [vmem:[#allocation10 + $0x544] ss:$8 sps:$4 sm:$0xff]   ;;  %v4200_v54 = vld [vmem:[#allocation10 + $0x540] ss:$8 sps:$4 sm:$0xff]  }
 0x28a   :  { %3117 = vmatprep.subr.bf16.mxu1 %v4148_v55  ;;  %3035 = vmatprep.subr.bf16.mxu0 %v4151_v56  ;;  %v4205_v55 = vld [vmem:[#allocation10 + $0x554] ss:$8 sps:$4 sm:$0xff]   ;;  %v4203_v56 = vld [vmem:[#allocation10 + $0x550] ss:$8 sps:$4 sm:$0xff]  }
 0x28d   :  { %3118 = vmatpush1.bf16.msra.mxu1 %v4146_v58  ;;  %3036 = vmatpush1.bf16.msra.mxu0 %v4149_v31  ;;  %v4208_v58 = vld [vmem:[#allocation10 + $0x564] ss:$8 sps:$4 sm:$0xff]   ;;  %v4206_v31 = vld [vmem:[#allocation10 + $0x560] ss:$8 sps:$4 sm:$0xff]  }
 0x28e   :  { %3119 = vmatprep.subr.bf16.mxu1 %v4154_v59  ;;  %3037 = vmatprep.subr.bf16.mxu0 %v4157_v60  ;;  %v4211_v59 = vld [vmem:[#allocation10 + $0x574] ss:$8 sps:$4 sm:$0xff]   ;;  %v4209_v60 = vld [vmem:[#allocation10 + $0x570] ss:$8 sps:$4 sm:$0xff]  }
 0x291   :  { %3120 = vmatpush1.bf16.msra.mxu1 %v4152_v61  ;;  %3038 = vmatpush1.bf16.msra.mxu0 %v4155_v62  ;;  %v4214_v61 = vld [vmem:[#allocation10 + $0x584] ss:$8 sps:$4 sm:$0xff]   ;;  %v4212_v62 = vld [vmem:[#allocation10 + $0x580] ss:$8 sps:$4 sm:$0xff]  }
 0x292   :  { %3121 = vmatprep.subr.bf16.mxu1 %v4160_v63  ;;  %3039 = vmatprep.subr.bf16.mxu0 %v4163_v0  ;;  %v4217_v63 = vld [vmem:[#allocation10 + $0x594] ss:$8 sps:$4 sm:$0xff]   ;;  %v4215_v0 = vld [vmem:[#allocation10 + $0x590] ss:$8 sps:$4 sm:$0xff]  }
 0x295   :  { %3122 = vmatpush1.bf16.msra.mxu1 %v4158_v1  ;;  %3040 = vmatpush1.bf16.msra.mxu0 %v4161_v2  ;;  %v4220_v1 = vld [vmem:[#allocation10 + $0x5a4] ss:$8 sps:$4 sm:$0xff]   ;;  %v4218_v2 = vld [vmem:[#allocation10 + $0x5a0] ss:$8 sps:$4 sm:$0xff]  }
 0x296   :  { %3123 = vmatprep.subr.bf16.mxu1 %v4166_v3  ;;  %3041 = vmatprep.subr.bf16.mxu0 %v4169_v4  ;;  %v4223_v3 = vld [vmem:[#allocation10 + $0x5b4] ss:$8 sps:$4 sm:$0xff]   ;;  %v4221_v4 = vld [vmem:[#allocation10 + $0x5b0] ss:$8 sps:$4 sm:$0xff]  }
 0x299   :  { %3124 = vmatpush1.bf16.msra.mxu1 %v4164_v5  ;;  %3042 = vmatpush1.bf16.msra.mxu0 %v4167_v6  ;;  %v4226_v5 = vld [vmem:[#allocation10 + $0x5c4] ss:$8 sps:$4 sm:$0xff]   ;;  %v4224_v6 = vld [vmem:[#allocation10 + $0x5c0] ss:$8 sps:$4 sm:$0xff]  }
 0x29a   :  { %3125 = vmatprep.subr.bf16.mxu1 %v4172_v7  ;;  %3043 = vmatprep.subr.bf16.mxu0 %v4175_v8  ;;  %v4229_v7 = vld [vmem:[#allocation10 + $0x5d4] ss:$8 sps:$4 sm:$0xff]   ;;  %v4227_v8 = vld [vmem:[#allocation10 + $0x5d0] ss:$8 sps:$4 sm:$0xff]  }
 0x29d   :  { %3126 = vmatpush1.bf16.msra.mxu1 %v4170_v9  ;;  %3044 = vmatpush1.bf16.msra.mxu0 %v4173_v12  ;;  %v4232_v9 = vld [vmem:[#allocation10 + $0x5e4] ss:$8 sps:$4 sm:$0xff]   ;;  %v4230_v12 = vld [vmem:[#allocation10 + $0x5e0] ss:$8 sps:$4 sm:$0xff]  }
 0x29e   :  { %3127 = vmatprep.subr.bf16.mxu1 %v4178_v13  ;;  %3045 = vmatprep.subr.bf16.mxu0 %v4181_v15  ;;  %v1365_v13 = vmax.f32 %v4737_v44, 0.0  ;;  %v4238_v15 = vld [vmem:[#allocation10 + $0x604] ss:$8 sps:$4 sm:$0xff]   ;;  %v4247_v44 = vld [vmem:[#allocation10 + $0x634] ss:$8 sps:$4 sm:$0xff]  }
 0x29f   :  { %v1348_v34 = vpop.f32.mrb[20].mxu0 }
 0x2a0   :  { %v4755_v51 = vadd.f32 %v1348_v34, %v366_v19  ;;  %v4757_v35 = vpop.f32.mrb[21].mxu0  ;;  %v4236_v19 = vld [vmem:[#allocation10 + $0x600] ss:$8 sps:$4 sm:$0xff]  }
 0x2a1   :  { %3128 = vmatpush1.bf16.msra.mxu1 %v4176_v27  ;;  %v1352_v17 = vpop.f32.mrb[22].mxu0  ;;  %3046 = vmatpush1.bf16.msra.mxu0 %v4179_v29  ;;  %v1381_v27 = vpack.c.bf16 %v1365_v13, %v1365_v13  ;;  %v4241_v29 = vld [vmem:[#allocation10 + $0x614] ss:$8 sps:$4 sm:$0xff]   ;;  %v4248_v34 = vld [vmem:[#allocation10 + $0x640] ss:$8 sps:$4 sm:$0xff]  }
 0x2a2   :  { %v1353_v39 = vpop.f32.mrb[23].mxu0  ;;  %3129 = vmatprep.subr.bf16.mxu1 %v4184_v30  ;;  %3047 = vmatprep.subr.bf16.mxu0 %v4187_v32  ;;  %v4244_v30 = vld [vmem:[#allocation10 + $0x624] ss:$8 sps:$4 sm:$0xff]   ;;  %v4242_v32 = vld [vmem:[#allocation10 + $0x620] ss:$8 sps:$4 sm:$0xff]  }
 0x2a3   :  { %v4253_v17 = vld [vmem:[#allocation10 + $0x654] ss:$8 sps:$4 sm:$0xff]   ;;  %v4332_v39 = vld [vmem:[#allocation11 + $0x40] sm:$0xff]  }
 0x2a4   :  { %v4295_v13 = vld [vmem:[#allocation10 + $0x734] ss:$8 sps:$4 sm:$0xff]  }
 0x2a5   :  { %3130 = vmatpush1.bf16.msra.mxu1 %v4182_v36  ;;  %3048 = vmatpush1.bf16.msra.mxu0 %v4185_v37  ;;  %v4251_v36 = vld [vmem:[#allocation10 + $0x650] ss:$8 sps:$4 sm:$0xff]   ;;  %v4256_v37 = vld [vmem:[#allocation10 + $0x664] ss:$8 sps:$4 sm:$0xff]  }
 0x2a6   :  { %3140 = vmatprep.subr.bf16.mxu1 %v4190_v57  ;;  %v4333_v57 = vld [vmem:[#allocation11] sm:$0xff]   ;;  %3876 = vmatprep.subr.bf16.mxu0 %v4332_v39  ;;  %v4325_v39 = vld [vmem:[#allocation10 + $0x7d4] ss:$8 sps:$4 sm:$0xff]  }
 0x2a8   :  { %3132 = vmatmul.mubr.bf16.vlgmr.msra.gmra.mrb[12].mxu1 %v1379_v43  ;;  %3050 = vmatmul.mubr.bf16.vlgmr.msra.gmra.mrb[24].mxu0 %v1375_v42  ;;  %v4335_v42 = vld [vmem:[#allocation11 + $0x8] sm:$0xff]  }
 0x2a9   :  { %3141 = vmatpush1.bf16.msra.mxu1 %v4188_v41  ;;  %3172 = vmatprep.mubr.bf16.mxu1 %v1382_v47  ;;  %v4257_v41 = vld [vmem:[#allocation10 + $0x670] ss:$8 sps:$4 sm:$0xff]   ;;  %v4262_v43 = vld [vmem:[#allocation10 + $0x684] ss:$8 sps:$4 sm:$0xff]   ;;  %v4260_v47 = vld [vmem:[#allocation10 + $0x680] ss:$8 sps:$4 sm:$0xff]  }
 0x2aa   :  { %3142 = vmatprep.subr.bf16.mxu1 %v4193_v46  ;;  %3877 = vmatpush3.bf16.msra.mxu0 %v4333_v57  ;;  %v4336_v46 = vld [vmem:[#allocation11 + $0x50] sm:$0xff]  }
 0x2ab   :  { %3878 = vmatprep.subr.bf16.mxu0 %v4334_v40  ;;  %v4323_v57 = vld [vmem:[#allocation10 + $0x7d0] ss:$8 sps:$4 sm:$0xff]   ;;  %v4328_v40 = vld [vmem:[#allocation10 + $0x7e4] ss:$8 sps:$4 sm:$0xff]  }
 0x2ad   :  { %3143 = vmatpush1.bf16.msra.mxu1 %v4191_v48  ;;  %v4337_v48 = vld [vmem:[#allocation11 + $0x10] sm:$0xff]  }
 0x2ae   :  { %3144 = vmatprep.subr.bf16.mxu1 %v4196_v24  ;;  %3879 = vmatpush3.bf16.msra.mxu0 %v4335_v42  ;;  %v4265_v24 = vld [vmem:[#allocation10 + $0x694] ss:$8 sps:$4 sm:$0xff]  }
 0x2af   :  { %3880 = vmatprep.subr.bf16.mxu0 %v4336_v46  ;;  %v4331_v42 = vld [vmem:[#allocation10 + $0x7f4] ss:$8 sps:$4 sm:$0xff]   ;;  %v1369_v46 = vmax.f32 %v4755_v51, 0.0  ;;  %v1643_v51 = vld [vmem:[%s4793_s6] sm:$0x3] }
 0x2b1   :  { %3145 = vmatpush1.bf16.msra.mxu1 %v4194_v50  ;;  %v4338_v50 = vld [vmem:[#allocation11 + $0x58] sm:$0xff]  }
 0x2b2   :  { %3146 = vmatprep.subr.bf16.mxu1 %v4199_v14  ;;  %v4263_v14 = vld [vmem:[#allocation10 + $0x690] ss:$8 sps:$4 sm:$0xff]   ;;  %3881 = vmatpush3.bf16.msra.mxu0 %v4337_v48 }
 0x2b3   :  { %3882 = vmatprep.subr.bf16.mxu0 %v4338_v50 }
 0x2b5   :  { %3147 = vmatpush1.bf16.msra.mxu1 %v4197_v52  ;;  %v4339_v52 = vld [vmem:[#allocation11 + $0x18] sm:$0xff]  }
 0x2b6   :  { %3148 = vmatprep.subr.bf16.mxu1 %v4202_v53  ;;  %v4268_v53 = vld [vmem:[#allocation10 + $0x6a4] ss:$8 sps:$4 sm:$0xff]   ;;  %3883 = vmatpush3.bf16.msra.mxu0 %v4339_v52  ;;  %v4344_v52 = vld [vmem:[#allocation11 + $0x70] sm:$0xff]  }
 0x2b9   :  { %3149 = vmatpush1.bf16.msra.mxu1 %v4200_v54  ;;  %v4340_v54 = vld [vmem:[#allocation11 + $0x60] sm:$0xff]  }
 0x2ba   :  { %3150 = vmatprep.subr.bf16.mxu1 %v4205_v55  ;;  %v4266_v55 = vld [vmem:[#allocation10 + $0x6a0] ss:$8 sps:$4 sm:$0xff]   ;;  %3884 = vmatprep.subr.bf16.mxu0 %v4340_v54  ;;  %v4346_v54 = vld [vmem:[#allocation11 + $0x78] sm:$0xff]  }
 0x2bd   :  { %3151 = vmatpush1.bf16.msra.mxu1 %v4203_v56  ;;  %v4341_v56 = vld [vmem:[#allocation11 + $0x20] sm:$0xff]  }
 0x2be   :  { %3152 = vmatprep.subr.bf16.mxu1 %v4208_v58  ;;  %v4271_v58 = vld [vmem:[#allocation10 + $0x6b4] ss:$8 sps:$4 sm:$0xff]   ;;  %3885 = vmatpush3.bf16.msra.mxu0 %v4341_v56  ;;  %v1648_v56 = vrot.slane %v1643_v51, %v4685_v21  ;;  %v3857_v21 = vld [vmem:[%s4795_s8] ss:$0 sm:$0xff]  ;;  %s4484_s8 = scalar_lea.vmem %s3459_s22, 128 }
 0x2bf   :  { %p4485_p6 = scmp.ne.s32.totalorder %s3459_s22, %s4484_s8  ;;  %p4490_p8 = scmp.lt.s32.totalorder %s4484_s8, %s4484_s8 }
 0x2c1   :  { %3153 = vmatpush1.bf16.msra.mxu1 %v4206_v31  ;;  %v4342_v31 = vld [vmem:[#allocation11 + $0x68] sm:$0xff]   ;;  %p4491_p9 = por %p4490_p8, %p4489_p7 }
 0x2c2   :  { %3154 = vmatprep.subr.bf16.mxu1 %v4211_v59  ;;  %v4269_v59 = vld [vmem:[#allocation10 + $0x6b0] ss:$8 sps:$4 sm:$0xff]   ;;  %3886 = vmatprep.subr.bf16.mxu0 %v4342_v31 }
 0x2c3   :  { %p4492_p10 = pnand %p4491_p9, %p4485_p6 }
 0x2c5   :  { %3155 = vmatpush1.bf16.msra.mxu1 %v4209_v60  ;;  %v4343_v60 = vld [vmem:[#allocation11 + $0x28] sm:$0xff]  }
 0x2c6   :  { %3156 = vmatprep.subr.bf16.mxu1 %v4214_v61  ;;  %v4274_v61 = vld [vmem:[#allocation10 + $0x6c4] ss:$8 sps:$4 sm:$0xff]   ;;  %3887 = vmatpush3.bf16.msra.mxu0 %v4343_v60 }
 0x2c7   :  { %3888 = vmatprep.subr.bf16.mxu0 %v4344_v52 }
 0x2c9   :  { %3157 = vmatpush1.bf16.msra.mxu1 %v4212_v62  ;;  %v4272_v62 = vld [vmem:[#allocation10 + $0x6c0] ss:$8 sps:$4 sm:$0xff]  }
 0x2ca   :  { %3158 = vmatprep.subr.bf16.mxu1 %v4217_v63  ;;  %v4277_v63 = vld [vmem:[#allocation10 + $0x6d4] ss:$8 sps:$4 sm:$0xff]  }
 0x2cd   :  { %3159 = vmatpush1.bf16.msra.mxu1 %v4215_v0  ;;  %v4275_v0 = vld [vmem:[#allocation10 + $0x6d0] ss:$8 sps:$4 sm:$0xff]  }
 0x2ce   :  { %3160 = vmatprep.subr.bf16.mxu1 %v4220_v1  ;;  %v4280_v1 = vld [vmem:[#allocation10 + $0x6e4] ss:$8 sps:$4 sm:$0xff]  }
 0x2d1   :  { %3161 = vmatpush1.bf16.msra.mxu1 %v4218_v2  ;;  %v370_v2 = vrot.slane %v4709_v18, %v337_v25  ;;  %v4287_v18 = vld [vmem:[#allocation10 + $0x710] ss:$8 sps:$4 sm:$0xff]   ;;  %v4292_v25 = vld [vmem:[#allocation10 + $0x724] ss:$8 sps:$4 sm:$0xff]  }
 0x2d2   :  { %3162 = vmatprep.subr.bf16.mxu1 %v4223_v3  ;;  %v4278_v3 = vld [vmem:[#allocation10 + $0x6e0] ss:$8 sps:$4 sm:$0xff]  }
 0x2d5   :  { %3163 = vmatpush1.bf16.msra.mxu1 %v4221_v4  ;;  %v4283_v4 = vld [vmem:[#allocation10 + $0x6f4] ss:$8 sps:$4 sm:$0xff]  }
 0x2d6   :  { %3164 = vmatprep.subr.bf16.mxu1 %v4226_v5  ;;  %v1351_v5 = vadd.f32 %v4757_v35, %v370_v2  ;;  %v4290_v35 = vld [vmem:[#allocation10 + $0x720] ss:$8 sps:$4 sm:$0xff]  }
 0x2d9   :  { %3165 = vmatpush1.bf16.msra.mxu1 %v4224_v6  ;;  %v4281_v6 = vld [vmem:[#allocation10 + $0x6f0] ss:$8 sps:$4 sm:$0xff]  }
 0x2da   :  { %3166 = vmatprep.subr.bf16.mxu1 %v4229_v7  ;;  %v1367_v7 = vmax.f32 %v4730_v45, 0.0  ;;  %v4293_v45 = vld [vmem:[#allocation10 + $0x730] ss:$8 sps:$4 sm:$0xff]  }
 0x2dd   :  { %3167 = vmatpush1.bf16.msra.mxu1 %v4227_v8  ;;  %v4286_v8 = vld [vmem:[#allocation10 + $0x704] ss:$8 sps:$4 sm:$0xff]  }
 0x2de   :  { %3168 = vmatprep.subr.bf16.mxu1 %v4232_v9  ;;  %v1370_v9 = vmax.f32 %v1351_v5, 0.0 }
 0x2e1   :  { %3169 = vmatpush1.bf16.msra.mxu1 %v4230_v12  ;;  %v4284_v12 = vld [vmem:[#allocation10 + $0x700] ss:$8 sps:$4 sm:$0xff]  }
 0x2e2   :  { %3170 = vmatprep.subr.bf16.mxu1 %v4235_v10  ;;  %v1383_v10 = vpack.c.bf16 %v1367_v7, %v1367_v7 }
 0x2e5   :  { %3171 = vmatpush1.bf16.msra.mxu1 %v4233_v11  ;;  %v1386_v11 = vpack.c.bf16 %v1370_v9, %v1370_v9 }
 0x2e6   :  { %3181 = vmatprep.subr.bf16.mxu1 %v4238_v15  ;;  %v4298_v15 = vld [vmem:[#allocation10 + $0x744] ss:$8 sps:$4 sm:$0xff]  }
 0x2e8   :  { %3173 = vmatmul.mubr.bf16.vlgmr.msra.gmra.mrb[12].mxu1 %v1381_v27  ;;  %v4299_v27 = vld [vmem:[#allocation10 + $0x750] ss:$8 sps:$4 sm:$0xff]  }
 0x2e9   :  { %3182 = vmatpush1.bf16.msra.mxu1 %v4236_v19  ;;  %3213 = vmatprep.mubr.bf16.mxu1 %v1384_v22  ;;  %v4301_v19 = vld [vmem:[#allocation10 + $0x754] ss:$8 sps:$4 sm:$0xff]   ;;  %v4302_v22 = vld [vmem:[#allocation10 + $0x760] ss:$8 sps:$4 sm:$0xff]  }
 0x2ea   :  { %3183 = vmatprep.subr.bf16.mxu1 %v4241_v29  ;;  %v4304_v29 = vld [vmem:[#allocation10 + $0x764] ss:$8 sps:$4 sm:$0xff]  }
 0x2ed   :  { %3184 = vmatpush1.bf16.msra.mxu1 %v4239_v26  ;;  %v4307_v26 = vld [vmem:[#allocation10 + $0x774] ss:$8 sps:$4 sm:$0xff]  }
 0x2ee   :  { %3185 = vmatprep.subr.bf16.mxu1 %v4244_v30  ;;  %v4305_v30 = vld [vmem:[#allocation10 + $0x770] ss:$8 sps:$4 sm:$0xff]  }
 0x2f1   :  { %3186 = vmatpush1.bf16.msra.mxu1 %v4242_v32  ;;  %v4310_v32 = vld [vmem:[#allocation10 + $0x784] ss:$8 sps:$4 sm:$0xff]  }
 0x2f2   :  { %3187 = vmatprep.subr.bf16.mxu1 %v4247_v44  ;;  %v4308_v44 = vld [vmem:[#allocation10 + $0x780] ss:$8 sps:$4 sm:$0xff]  }
 0x2f5   :  { %3188 = vmatpush1.bf16.msra.mxu1 %v4245_v33  ;;  %v4313_v33 = vld [vmem:[#allocation10 + $0x794] ss:$8 sps:$4 sm:$0xff]  }
 0x2f6   :  { %3189 = vmatprep.subr.bf16.mxu1 %v4250_v49  ;;  %v4311_v49 = vld [vmem:[#allocation10 + $0x790] ss:$8 sps:$4 sm:$0xff]  }
 0x2f9   :  { %3190 = vmatpush1.bf16.msra.mxu1 %v4248_v34  ;;  %v4316_v34 = vld [vmem:[#allocation10 + $0x7a4] ss:$8 sps:$4 sm:$0xff]  }
 0x2fa   :  { %3191 = vmatprep.subr.bf16.mxu1 %v4253_v17  ;;  %v4314_v17 = vld [vmem:[#allocation10 + $0x7a0] ss:$8 sps:$4 sm:$0xff]  }
 0x2fd   :  { %3192 = vmatpush1.bf16.msra.mxu1 %v4251_v36  ;;  %v4319_v36 = vld [vmem:[#allocation10 + $0x7b4] ss:$8 sps:$4 sm:$0xff]  }
 0x2fe   :  { %3193 = vmatprep.subr.bf16.mxu1 %v4256_v37  ;;  %v4317_v37 = vld [vmem:[#allocation10 + $0x7b0] ss:$8 sps:$4 sm:$0xff]  }
 0x301   :  { %3194 = vmatpush1.bf16.msra.mxu1 %v4254_v38  ;;  %v4322_v38 = vld [vmem:[#allocation10 + $0x7c4] ss:$8 sps:$4 sm:$0xff]  }
 0x302   :  { %3195 = vmatprep.subr.bf16.mxu1 %v4259_v28  ;;  %v4320_v28 = vld [vmem:[#allocation10 + $0x7c0] ss:$8 sps:$4 sm:$0xff]  }
 0x305   :  { %3196 = vmatpush1.bf16.msra.mxu1 %v4257_v41  ;;  %v4326_v41 = vld [vmem:[#allocation10 + $0x7e0] ss:$8 sps:$4 sm:$0xff]  }
 0x306   :  { %3197 = vmatprep.subr.bf16.mxu1 %v4262_v43  ;;  %v4329_v43 = vld [vmem:[#allocation10 + $0x7f0] ss:$8 sps:$4 sm:$0xff]  }
 0x309   :  { %3198 = vmatpush1.bf16.msra.mxu1 %v4260_v47  ;;  %v1385_v47 = vpack.c.bf16 %v1369_v46, %v1369_v46 }
 0x30a   :  { %3199 = vmatprep.subr.bf16.mxu1 %v4265_v24 }
 0x30d   :  { %3200 = vmatpush1.bf16.msra.mxu1 %v4263_v14 }
 0x30e   :  { %3201 = vmatprep.subr.bf16.mxu1 %v4268_v53  ;;  %v4345_v53 = vld [vmem:[#allocation11 + $0x30] sm:$0xff]  }
 0x30f   :  { %3889 = vmatpush3.bf16.msra.mxu0 %v4345_v53 }
 0x310   :  { %3890 = vmatprep.subr.bf16.mxu0 %v4346_v54 }
 0x311   :  { %3202 = vmatpush1.bf16.msra.mxu1 %v4266_v55  ;;  %v4347_v55 = vld [vmem:[#allocation11 + $0x38] sm:$0xff]  }
 0x312   :  { %3203 = vmatprep.subr.bf16.mxu1 %v4271_v58  ;;  %v1652_v58 = vrot.slane %v1643_v51, %v4690_v23 }
 0x313   :  { %3891 = vmatpush3.bf16.msra.mxu0 %v4347_v55 }
 0x315   :  { %3204 = vmatpush1.bf16.msra.mxu1 %v4269_v59 }
 0x316   :  { %3205 = vmatprep.subr.bf16.mxu1 %v4274_v61 }
 0x319   :  { %3206 = vmatpush1.bf16.msra.mxu1 %v4272_v62 }
 0x31a   :  { %3207 = vmatprep.subr.bf16.mxu1 %v4277_v63 }
 0x31d   :  { %3208 = vmatpush1.bf16.msra.mxu1 %v4275_v0 }
 0x31e   :  { %3209 = vmatprep.subr.bf16.mxu1 %v4280_v1 }
 0x321   :  { %3210 = vmatpush1.bf16.msra.mxu1 %v4278_v3 }
 0x322   :  { %3211 = vmatprep.subr.bf16.mxu1 %v4283_v4 }
 0x325   :  { %3212 = vmatpush1.bf16.msra.mxu1 %v4281_v6 }
 0x326   :  { %3222 = vmatprep.subr.bf16.mxu1 %v4286_v8 }
 0x328   :  { %3214 = vmatmul.mubr.bf16.vlgmr.msra.gmra.mrb[12].mxu1 %v1383_v10 }
 0x329   :  { %3223 = vmatpush1.bf16.msra.mxu1 %v4284_v12  ;;  %3254 = vmatprep.mubr.bf16.mxu1 %v1386_v11 }
 0x32a   :  { %3224 = vmatprep.subr.bf16.mxu1 %v4289_v20 }
 0x32d   :  { %3225 = vmatpush1.bf16.msra.mxu1 %v4287_v18 }
 0x32e   :  { %3226 = vmatprep.subr.bf16.mxu1 %v4292_v25 }
 0x331   :  { %3227 = vmatpush1.bf16.msra.mxu1 %v4290_v35 }
 0x332   :  { %3228 = vmatprep.subr.bf16.mxu1 %v4295_v13 }
 0x335   :  { %3229 = vmatpush1.bf16.msra.mxu1 %v4293_v45 }
 0x336   :  { %3230 = vmatprep.subr.bf16.mxu1 %v4298_v15 }
 0x339   :  { %3231 = vmatpush1.bf16.msra.mxu1 %v4296_v16 }
 0x33a   :  { %3232 = vmatprep.subr.bf16.mxu1 %v4301_v19 }
 0x33d   :  { %3233 = vmatpush1.bf16.msra.mxu1 %v4299_v27 }
 0x33e   :  { %3234 = vmatprep.subr.bf16.mxu1 %v4304_v29 }
 0x341   :  { %3235 = vmatpush1.bf16.msra.mxu1 %v4302_v22 }
 0x342   :  { %3236 = vmatprep.subr.bf16.mxu1 %v4307_v26 }
 0x345   :  { %3237 = vmatpush1.bf16.msra.mxu1 %v4305_v30 }
 0x346   :  { %3238 = vmatprep.subr.bf16.mxu1 %v4310_v32 }
 0x349   :  { %3239 = vmatpush1.bf16.msra.mxu1 %v4308_v44 }
 0x34a   :  { %3240 = vmatprep.subr.bf16.mxu1 %v4313_v33 }
 0x34d   :  { %3241 = vmatpush1.bf16.msra.mxu1 %v4311_v49 }
 0x34e   :  { %3242 = vmatprep.subr.bf16.mxu1 %v4316_v34 }
 0x351   :  { %3243 = vmatpush1.bf16.msra.mxu1 %v4314_v17 }
 0x352   :  { %3244 = vmatprep.subr.bf16.mxu1 %v4319_v36 }
 0x355   :  { %3245 = vmatpush1.bf16.msra.mxu1 %v4317_v37 }
 0x356   :  { %3246 = vmatprep.subr.bf16.mxu1 %v4322_v38 }
 0x359   :  { %3247 = vmatpush1.bf16.msra.mxu1 %v4320_v28 }
 0x35a   :  { %3248 = vmatprep.subr.bf16.mxu1 %v4325_v39 }
 0x35d   :  { %3249 = vmatpush1.bf16.msra.mxu1 %v4323_v57 }
 0x35e   :  { %3250 = vmatprep.subr.bf16.mxu1 %v4328_v40 }
 0x361   :  { %3251 = vmatpush1.bf16.msra.mxu1 %v4326_v41 }
 0x362   :  { %3252 = vmatprep.subr.bf16.mxu1 %v4331_v42 }
 0x365   :  { %3253 = vmatpush1.bf16.msra.mxu1 %v4329_v43 }
 0x368   :  { %3255 = vmatmul.mubr.bf16.vlgmr.msra.gmra.mrb[12].mxu1 %v1385_v47 }
 0x37b   :  { %v3051_v48 = vpop.f32.mrb[24].mxu0 }
 0x37c   :  { %v3053_v24 = vpop.f32.mrb[25].mxu0  ;;  %v3904_v31 = vadd.f32 %v3051_v48, %v1648_v56 }
 0x37d   :  { %v3055_v50 = vpop.f32.mrb[26].mxu0  ;;  %v3906_v59 = vadd.f32 %v3053_v24, %v1652_v58 }
 0x37e   :  { %v3056_v14 = vpop.f32.mrb[27].mxu0 }
 0x43b   :  { %v3256_v60 = vpop.f32.mrb[12].mxu1 }
 0x43c   :  { %v3905_v61 = vadd.f32 %v3904_v31, %v3256_v60  ;;  %v3258_v62 = vpop.f32.mrb[13].mxu1 }
 0x43d   :  { %v3907_v63 = vadd.f32 %v3906_v59, %v3258_v62  ;;  %v3260_v0 = vpop.f32.mrb[14].mxu1 }
 0x43e   :  { %v3263_v1 = vmax.f32 %v3905_v61, 0.0  ;;  %v3261_v2 = vpop.f32.mrb[15].mxu1 }
 0x43f   :  { %v3264_v3 = vmax.f32 %v3907_v63, 0.0 }
 0x440   :  { %v3265_v5 = vpack.c.bf16 %v3263_v1, %v3263_v1 }
 0x441   :  { %v3266_v4 = vpack.c.bf16 %v3264_v3, %v3264_v3 }
 0x443   :  { %3434 = vmatprep.mubr.bf16.mxu0 %v3266_v4 }
 0x444   :  { %3435 = vmatmul.mubr.bf16.vlgmr.msra.gmra.mrb[28].mxu0 %v3265_v5 }
 0x517   :  { %v3892_v6 = vpop.f32.mrb[28].mxu0 }
 0x518   :  { %v3893_v7 = vpop.f32.mrb[29].mxu0 }
 0x519   :  { %v3894_v23 = vadd.f32 %v3893_v7, %v3892_v6  ;;  %v3895_v8 = vpop.f32.mrb[30].mxu0 }
 0x51a   :  { %v3896_v9 = vpop.f32.mrb[31].mxu0 }
 0x51b   :  { %v3437_v12 = vadd.f32 %v3894_v23, %v3857_v21 }
 0x51d   :  { %3442 = vmax.xlane.f32.xlu0 %v3437_v12 }
 0x5aa   :  { %v3443_v10 = vpop.xlane.xlu0 %3442 }
 0x5ab   :  { %v3444_v20 = vsub.f32 %v3437_v12, %v3443_v10 }
 0x5ad   :  { %v3445_v11 = vmul.f32 1.442695, %v3444_v20 }
 0x5af   :  { %4348 = vpow2.f32 %v3445_v11 }
 0x5b9   :  { %v4349_v18 = vpop.eup %4348 }
 0x5ba   :  { %3447 = vadd.xlane.f32.xlu0 %v4349_v18 }
 0x647   :  { %v3448_v25 = vpop.xlane.xlu0 %3447 }
 0x648   :  { %4350 = vrcp.f32 %v3448_v25 }
 0x652   :  { %v4351_v35 = vpop.eup %4350 }
 0x653   :  { %v3450_v13 = vmul.f32 %v4351_v35, %v4349_v18 }
 0x655   :  { %3451 = vst [vmem:[#allocation13] sm:$0xff] %v3450_v13 }
 0x656   :  { %4495 = shalt.err (!%p4492_p10)
}
 0x657   :  { %s4496_s4 = scalar_lea.hbm %s4796_s9, 128 }
 0x658   :  { %p4497_p11 = scmp.ne.s32.totalorder %s4796_s9, %s4496_s4  ;;  %p4500_p12 = scmp.lt.u32.totalorder %s4496_s4, %s4796_s9 }
 0x65a   :  { %p4502_p13 = pnand %p4500_p12, %p4497_p11 }
 0x65c   :  { %4505 = shalt.err (!%p4502_p13)
}
 0x65d   :  { %3461 = dma.vmem_to_hbm [thread:$0]  %s3459_s22, 128, %s4796_s9, [#allocation4]  }
 0x65e   :  { %4514 = dma.done.wait [#allocation4], 128  }
 0x65f   :  { %4515 = vsyncadd [#allocation4], 4294967168 }
 0x660   :  { %3465 = vsyncpa [#allocation3], 1 }
 0x661   :  { %3466 = vsyncpa [#allocation6], 1 }
 0x662   :  { %3467 = vsyncpa [#allocation9], 1 }
 0x663   :  { %3468 = vsyncpa [#allocation12], 1 }
 0x664   :  { %3469 = vsyncpa [#allocation4], 1 }

</bundles_post_ra>
